<compile_context>
chip_gen: v7x
topology: tpu7x:2x2x1
jax: 0.10.0
libtpu: 0.0.40
codegen_flags: <defaults>
</compile_context>

<pallas_src>
import functools

import jax
import jax.numpy as jnp
from jax.experimental import pallas as pl
from jax.experimental.pallas import tpu as pltpu


# ----------------------------------------------------------------------------
# Kernel
# ----------------------------------------------------------------------------
def _mlp_kernel(x_ref, wgu_ref, wd_ref, o_ref, acc_ref):
    # x_ref:   (TM, H)       token tile (block index fixed across the k axis)
    # wgu_ref: (H, 2*TI)     [gate | up] weight chunk for this k (leading axis squeezed)
    # wd_ref:  (TI, H)       down-proj weight chunk for this k   (leading axis squeezed)
    # o_ref:   (TM, H)       output tile
    # acc_ref: (TM, H) f32   running down-proj accumulator
    k = pl.program_id(1)

    @pl.when(k == 0)
    def _():
        acc_ref[...] = jnp.zeros_like(acc_ref)

    ti = wd_ref.shape[0]                       # intermediate chunk size
    x = x_ref[...]                             # (TM, H), bf16

    # One wide MXU matmul for gate+up, f32 accumulation.
    gu = jnp.dot(x, wgu_ref[...], preferred_element_type=jnp.float32)  # (TM, 2*TI)
    gate = gu[:, :ti]
    up = gu[:, ti:]

    # SiluAndMul in f32 (sigmoid goes to the EUP), then downcast for the
    # bf16 MXU down-projection.
    act = gate * jax.nn.sigmoid(gate) * up
    acc_ref[...] += jnp.dot(act.astype(wd_ref.dtype), wd_ref[...],
                            preferred_element_type=jnp.float32)

    @pl.when(k == pl.num_programs(1) - 1)
    def _():
        o_ref[...] = acc_ref[...].astype(o_ref.dtype)


# ----------------------------------------------------------------------------
# Generation-aware tile selection
# ----------------------------------------------------------------------------
def _round_up(x, m):
    return (x + m - 1) // m * m


@functools.lru_cache(maxsize=1)
def _vmem_budget_bytes():
    """Physical VMEM capacity minus ~8 MiB headroom (Mosaic internal scratch,
    f32 gate/up/act intermediates not in our tile estimate)."""
    cap = None
    try:
        cap = getattr(pltpu.get_tpu_info(), "vmem_capacity_bytes", None)
    except Exception:
        cap = None
    if not cap:
        cap = 64 * 1024 * 1024          # conservative fallback: v7x per-TC VMEM
    return max(int(cap) - (8 << 20), 16 << 20)


def _footprint_bytes(tm, ti, h, n_wbuf):
    """Estimated per-step VMEM footprint for a (tm, ti) tiling (bf16 compute)."""
    weights = n_wbuf * (2 * h * ti + ti * h) * 2          # [gate|up] + down slabs
    x_out_acc = 2 * tm * h * 2 + 2 * tm * h * 2 + tm * h * 4  # x(2buf)+out(2buf)+f32 acc
    interm = tm * (2 * ti) * 4 + tm * ti * 4 + tm * ti * 2    # gu f32, act f32, act bf16
    return weights + x_out_acc + interm


def _auto_block_inter(h, inter, budget):
    """Largest 128-multiple intermediate chunk whose streamed slabs fit VMEM
    together with the generation-target token tile."""
    big = budget >= (96 << 20)              # 128 MiB parts (v5e/v6e) vs v7x (64 MiB)
    tm_assumed = 1024 if big else 512
    ti_cap = min(1024 if big else 512, max(128, _round_up(inter, 128)))
    ti = 128
    cand = 128
    while cand <= ti_cap:
        if _footprint_bytes(tm_assumed, cand, h, 2) <= int(0.90 * budget):
            ti = cand
        cand += 128
    return ti


def _auto_block_tokens(t, h, ti, budget):
    """Token tile == arithmetic intensity over streamed weights; target 1024 on
    128 MiB parts / 512 on v7x, clamped to the (padded) token count and VMEM."""
    big = budget >= (96 << 20)
    tm = min(1024 if big else 512, _round_up(max(int(t), 1), 16))
    while tm > 16 and _footprint_bytes(tm, ti, h, 2) > int(0.92 * budget):
        tm = max(16, _round_up(tm // 2, 16))
    return tm


# ----------------------------------------------------------------------------
# One-time weight re-layout (do at weight-load time, NOT per forward call)
# ----------------------------------------------------------------------------
def prepare_deepseek_v2_mlp_weights(w_gate, w_up, w_down, *, block_inter=None,
                                    compute_dtype=jnp.bfloat16):
    """w_gate/w_up: [H, I]; w_down: [I, H] ->
       wgu: (nk, H, 2*ti) [gate|up] chunks,  wd: (nk, ti, H) down chunks.
    The intermediate dim is zero-padded to a multiple of block_inter (harmless:
    silu(0)*0 == 0 and padded down rows see a zero activation)."""
    h, inter = w_gate.shape
    assert w_up.shape == (h, inter) and w_down.shape == (inter, h)
    assert h % 128 == 0, "hidden_size must be a multiple of 128"
    if block_inter is None:
        block_inter = _auto_block_inter(h, inter, _vmem_budget_bytes())
    ti = int(block_inter)
    assert ti % 128 == 0, "block_inter must be a multiple of 128"

    inter_pad = _round_up(inter, ti)
    if inter_pad != inter:
        pad = inter_pad - inter
        w_gate = jnp.pad(w_gate, ((0, 0), (0, pad)))
        w_up = jnp.pad(w_up, ((0, 0), (0, pad)))
        w_down = jnp.pad(w_down, ((0, pad), (0, 0)))
    nk = inter_pad // ti

    wg = w_gate.astype(compute_dtype).reshape(h, nk, ti).transpose(1, 0, 2)   # (nk, H, ti)
    wu = w_up.astype(compute_dtype).reshape(h, nk, ti).transpose(1, 0, 2)     # (nk, H, ti)
    wgu = jnp.concatenate([wg, wu], axis=-1)                                  # (nk, H, 2*ti)
    wd = w_down.astype(compute_dtype).reshape(nk, ti, h)                      # (nk, ti, H)
    return wgu, wd
    # TODO(synk): add an 8-bit weight-slab path (int8 on v5e/v6e, fp8 on v7x)
    # with per-chunk scales dequantized in-kernel, for the decode / small-T
    # weight-streaming-bound regime.


# ----------------------------------------------------------------------------
# Forward pass
# ----------------------------------------------------------------------------
@functools.partial(
    jax.jit,
    static_argnames=("block_tokens", "weight_buffers", "vmem_limit_bytes", "out_dtype"))
def _mlp_call(x, wgu, wd, *, block_tokens, weight_buffers, vmem_limit_bytes, out_dtype):
    t, h = x.shape
    nk, ti, _ = wd.shape
    assert wgu.shape == (nk, h, 2 * ti)
    assert h % 128 == 0
    tm = int(block_tokens)
    assert tm % 8 == 0

    # Pad tokens so decode-like shapes work without asserting; zero rows are
    # sliced off afterwards.
    t_pad = _round_up(max(t, 1), tm)
    xc = x.astype(wgu.dtype)
    if t_pad != t:
        xc = jnp.pad(xc, ((0, t_pad - t), (0, 0)))
    nt = t_pad // tm

    # Optional deeper weight buffering (review: Buffered(3) helps near the
    # roofline crossover on 128 MiB parts).  Default 2 for portability.
    wspec_kwargs = {}
    if weight_buffers != 2:
        wspec_kwargs["pipeline_mode"] = pl.Buffered(int(weight_buffers))

    cbytes = jnp.dtype(wgu.dtype).itemsize
    obytes = jnp.dtype(out_dtype).itemsize
    inter_pad = nk * ti
    flops = 2 * t_pad * h * (2 * inter_pad) + 2 * t_pad * inter_pad * h
    bytes_accessed = (t_pad * h * cbytes                       # x read
                      + nt * 3 * h * inter_pad * cbytes        # weights re-streamed per token tile
                      + t_pad * h * obytes)                    # output write

    out = pl.pallas_call(
        _mlp_kernel,
        out_shape=jax.ShapeDtypeStruct((t_pad, h), out_dtype),
        grid_spec=pltpu.PrefetchScalarGridSpec(
            num_scalar_prefetch=0,
            grid=(nt, nk),                                     # reduction axis last
            in_specs=[
                pl.BlockSpec((tm, h), lambda i, k: (i, 0)),                     # x: fixed over k
                pl.BlockSpec((pl.Squeezed(), h, 2 * ti),
                             lambda i, k: (k, 0, 0), **wspec_kwargs),           # [gate|up] chunk
                pl.BlockSpec((pl.Squeezed(), ti, h),
                             lambda i, k: (k, 0, 0), **wspec_kwargs),           # down chunk
            ],
            out_specs=pl.BlockSpec((tm, h), lambda i, k: (i, 0)),
            scratch_shapes=[pltpu.VMEM((tm, h), jnp.float32)],
        ),
        compiler_params=pltpu.CompilerParams(
            # TODO(synk): on v7x verify the token axis shards across both
            # TensorCores ("parallel" should map to megacore); otherwise use
            # pltpu.CORE_PARALLEL / core_map with a leading size-2 axis.
            dimension_semantics=("parallel", "arbitrary"),
            vmem_limit_bytes=int(vmem_limit_bytes),
        ),
        cost_estimate=pl.CostEstimate(
            flops=flops, transcendentals=t_pad * inter_pad,
            bytes_accessed=bytes_accessed),
    )(xc, wgu, wd)

    if t_pad != t:
        out = out[:t]
    return out


def deepseek_v2_mlp(x, wgu, wd, *, block_tokens=None, weight_buffers=2):
    """DeepseekV2MLP forward.  x: [..., H]; (wgu, wd) from
    prepare_deepseek_v2_mlp_weights(). Returns [..., H] in x.dtype."""
    *lead, h = x.shape
    t = 1
    for d in lead:
        t *= int(d)
    budget = _vmem_budget_bytes()
    if block_tokens is None:
        block_tokens = _auto_block_tokens(t, h, int(wd.shape[1]), budget)
    y = _mlp_call(x.reshape(t, h), wgu, wd,
                  block_tokens=int(block_tokens),
                  weight_buffers=int(weight_buffers),
                  vmem_limit_bytes=int(budget),
                  out_dtype=x.dtype)
    return y.reshape(*lead, h)
    # TODO(synk): tensor-parallel all-reduce of RowParallelLinear
    # (reduce_results) is a no-op on a single device and is not implemented.


# ----------------------------------------------------------------------------
# Reference (mirrors kernel numerics: bf16 operands, f32 accumulation)
# ----------------------------------------------------------------------------
def _reference(x, w_gate, w_up, w_down, compute_dtype=jnp.bfloat16):
    xf = x.astype(compute_dtype).astype(jnp.float32)
    wg = w_gate.astype(compute_dtype).astype(jnp.float32)
    wu = w_up.astype(compute_dtype).astype(jnp.float32)
    wd = w_down.astype(compute_dtype).astype(jnp.float32)
    gate = xf @ wg
    up = xf @ wu
    act = (gate * jax.nn.sigmoid(gate) * up).astype(compute_dtype).astype(jnp.float32)
    return (act @ wd).astype(x.dtype)


if __name__ == "__main__":
    # Small shapes consistent with the module (tokens x hidden, intermediate).
    # T=200 is deliberately NOT a tile multiple to exercise token padding.
    T, H, I = 200, 256, 512
    key = jax.random.PRNGKey(0)
    kx, kg, kd = jax.random.split(key, 3)

    x = jax.random.normal(kx, (T, H), dtype=jnp.float32).astype(jnp.bfloat16)
    # PyTorch layout: gate_up_proj.weight is [2*I, H], down_proj.weight is [H, I].
    gate_up_w = (jax.random.normal(kg, (2 * I, H), dtype=jnp.float32) * 0.05
                 ).astype(jnp.bfloat16)
    down_w = (jax.random.normal(kd, (H, I), dtype=jnp.float32) * 0.05
              ).astype(jnp.bfloat16)

    w_gate = gate_up_w[:I, :].T      # [H, I]
    w_up = gate_up_w[I:, :].T        # [H, I]
    w_down = down_w.T                # [I, H]

    ref = _reference(x, w_gate, w_up, w_down)

    # 1) Explicit small tiles: exercises multi-step reduction (nk=2), token
    #    padding (200 -> 256) and multiple token tiles.
    wgu_s, wd_s = prepare_deepseek_v2_mlp_weights(w_gate, w_up, w_down,
                                                  block_inter=256)
    out_s = deepseek_v2_mlp(x, wgu_s, wd_s, block_tokens=128)
    jax.block_until_ready(out_s)

    # 2) Auto, generation-aware tiles (what a real model would use).
    wgu_a, wd_a = prepare_deepseek_v2_mlp_weights(w_gate, w_up, w_down)
    out_a = deepseek_v2_mlp(x, wgu_a, wd_a)
    jax.block_until_ready(out_a)

    for out in (out_s, out_a):
        assert out.shape == (T, H)
        err = jnp.max(jnp.abs(out.astype(jnp.float32) - ref.astype(jnp.float32)))
        assert err < 5e-2, f"mismatch vs reference: max abs err {err}"

    print("KERNEL_OK")
</pallas_src>

<mosaic_0001>
module attributes {stable_mosaic.version = 11 : i64} {
  func.func @_mlp_kernel(%arg0: i32, %arg1: i32, %arg2: memref<128x256xbf16, #tpu.memory_space<vmem>>, %arg3: memref<1x256x512xbf16, #tpu.memory_space<vmem>>, %arg4: memref<1x256x256xbf16, #tpu.memory_space<vmem>>, %arg5: memref<128x256xbf16, #tpu.memory_space<vmem>>, %arg6: memref<128x256xf32, #tpu.memory_space<vmem>>) attributes {dimension_semantics = [#tpu.dimension_semantics<parallel>, #tpu.dimension_semantics<arbitrary>], iteration_bounds = array<i64: 2, 2>, scalar_prefetch = 0 : i64, scratch_operands = 1 : i64, tpu.core_type = #tpu.core_type<tc>, window_params = [{transform_indices = @transform_0, window_bounds = array<i64: 128, 256>}, {transform_indices = @transform_1, window_bounds = array<i64: 1, 256, 512>}, {transform_indices = @transform_2, window_bounds = array<i64: 1, 256, 256>}, {transform_indices = @transform_3, window_bounds = array<i64: 128, 256>}]} {
    %c0_i32 = arith.constant 0 : i32
    %0 = arith.cmpi eq, %arg1, %c0_i32 : i32
    %1 = arith.extui %0 : i1 to i32
    %c0_i32_0 = arith.constant 0 : i32
    %2 = arith.cmpi ne, %1, %c0_i32_0 : i32
    scf.if %2 {
      %cst_15 = arith.constant 0.000000e+00 : f32
      %26 = vector.broadcast %cst_15 : f32 to vector<128x256xf32>
      %c0_16 = arith.constant 0 : index
      %c0_17 = arith.constant 0 : index
      %27 = vector.load %arg6[%c0_16, %c0_17] : memref<128x256xf32, #tpu.memory_space<vmem>>, vector<128x256xf32>
      tpu.vector_store %arg6[%c0_16, %c0_17], %26 {strides = array<i32>} : memref<128x256xf32, #tpu.memory_space<vmem>>, vector<128x256xf32>,
    } else {
    }
    %c0 = arith.constant 0 : index
    %c0_1 = arith.constant 0 : index
    %3 = vector.load %arg2[%c0, %c0_1] : memref<128x256xbf16, #tpu.memory_space<vmem>>, vector<128x256xbf16>
    %c0_2 = arith.constant 0 : index
    %c0_3 = arith.constant 0 : index
    %c0_4 = arith.constant 0 : index
    %4 = vector.load %arg3[%c0_2, %c0_3, %c0_4] : memref<1x256x512xbf16, #tpu.memory_space<vmem>>, vector<1x256x512xbf16>
    %5 = vector.shape_cast %4 : vector<1x256x512xbf16> to vector<256x512xbf16>
    %cst = arith.constant dense<0.000000e+00> : vector<128x512xf32>
    %6 = tpu.matmul %3, %5, %cst {dimension_numbers = #tpu.dot_dimension_numbers<[1], [0], [0], [1], [0, 0, 1, 1], [], []>} : vector<128x256xbf16>, vector<256x512xbf16>, vector<128x512xf32> -> vector<128x512xf32>
    %7 = vector.extract_strided_slice %6 {offsets = [0, 0], sizes = [128, 256], strides = [1, 1]} : vector<128x512xf32> to vector<128x256xf32>
    %8 = vector.extract_strided_slice %6 {offsets = [0, 256], sizes = [128, 256], strides = [1, 1]} : vector<128x512xf32> to vector<128x256xf32>
    %9 = arith.negf %7 : vector<128x256xf32>
    %10 = math.exp %9 : vector<128x256xf32>
    %cst_5 = arith.constant 1.000000e+00 : f32
    %11 = vector.broadcast %cst_5 : f32 to vector<128x256xf32>
    %12 = arith.addf %11, %10 : vector<128x256xf32>
    %13 = arith.divf %11, %12 : vector<128x256xf32>
    %14 = arith.mulf %7, %13 : vector<128x256xf32>
    %15 = arith.mulf %14, %8 : vector<128x256xf32>
    %c0_6 = arith.constant 0 : index
    %c0_7 = arith.constant 0 : index
    %16 = vector.load %arg6[%c0_6, %c0_7] : memref<128x256xf32, #tpu.memory_space<vmem>>, vector<128x256xf32>
    %17 = arith.truncf %15 : vector<128x256xf32> to vector<128x256xbf16>
    %c0_8 = arith.constant 0 : index
    %c0_9 = arith.constant 0 : index
    %c0_10 = arith.constant 0 : index
    %18 = vector.load %arg4[%c0_8, %c0_9, %c0_10] : memref<1x256x256xbf16, #tpu.memory_space<vmem>>, vector<1x256x256xbf16>
    %19 = vector.shape_cast %18 : vector<1x256x256xbf16> to vector<256x256xbf16>
    %cst_11 = arith.constant dense<0.000000e+00> : vector<128x256xf32>
    %20 = tpu.matmul %17, %19, %cst_11 {dimension_numbers = #tpu.dot_dimension_numbers<[1], [0], [0], [1], [0, 0, 1, 1], [], []>} : vector<128x256xbf16>, vector<256x256xbf16>, vector<128x256xf32> -> vector<128x256xf32>
    %21 = arith.addf %16, %20 : vector<128x256xf32>
    %c0_12 = arith.constant 0 : index
    %c0_13 = arith.constant 0 : index
    %22 = vector.load %arg6[%c0_12, %c0_13] : memref<128x256xf32, #tpu.memory_space<vmem>>, vector<128x256xf32>
    tpu.vector_store %arg6[%c0_12, %c0_13], %21 {strides = array<i32>} : memref<128x256xf32, #tpu.memory_space<vmem>>, vector<128x256xf32>,
    %c1_i32 = arith.constant 1 : i32
    %23 = arith.cmpi eq, %arg1, %c1_i32 : i32
    %24 = arith.extui %23 : i1 to i32
    %c0_i32_14 = arith.constant 0 : i32
    %25 = arith.cmpi ne, %24, %c0_i32_14 : i32
    scf.if %25 {
      %c0_15 = arith.constant 0 : index
      %c0_16 = arith.constant 0 : index
      %26 = vector.load %arg6[%c0_15, %c0_16] : memref<128x256xf32, #tpu.memory_space<vmem>>, vector<128x256xf32>
      %27 = arith.truncf %26 : vector<128x256xf32> to vector<128x256xbf16>
      %c0_17 = arith.constant 0 : index
      %c0_18 = arith.constant 0 : index
      %28 = vector.load %arg5[%c0_17, %c0_18] : memref<128x256xbf16, #tpu.memory_space<vmem>>, vector<128x256xbf16>
      tpu.vector_store %arg5[%c0_17, %c0_18], %27 {strides = array<i32>} : memref<128x256xbf16, #tpu.memory_space<vmem>>, vector<128x256xbf16>,
    } else {
    }
    return
  }
  func.func @transform_0(%arg0: i32, %arg1: i32) -> (i32, i32) {
    %c0_i32 = arith.constant 0 : i32
    %c0_i32_0 = arith.constant 0 : i32
    return %arg0, %c0_i32 : i32, i32
  }
  func.func @transform_1(%arg0: i32, %arg1: i32) -> (i32, i32, i32) {
    %c0_i32 = arith.constant 0 : i32
    %c0_i32_0 = arith.constant 0 : i32
    %c0_i32_1 = arith.constant 0 : i32
    return %arg1, %c0_i32, %c0_i32_0 : i32, i32, i32
  }
  func.func @transform_2(%arg0: i32, %arg1: i32) -> (i32, i32, i32) {
    %c0_i32 = arith.constant 0 : i32
    %c0_i32_0 = arith.constant 0 : i32
    %c0_i32_1 = arith.constant 0 : i32
    return %arg1, %c0_i32, %c0_i32_0 : i32, i32, i32
  }
  func.func @transform_3(%arg0: i32, %arg1: i32) -> (i32, i32) {
    %c0_i32 = arith.constant 0 : i32
    %c0_i32_0 = arith.constant 0 : i32
    return %arg0, %c0_i32 : i32, i32
  }
}

</mosaic_0001>

<bundles_post_ra>
// kernel: _mlp_call.1
= control target key start
LH: loop header
LB: loop body
LE: loop exit
PB: predicated region body
PF: predicated region fallthrough
CT: control target
= control target key end

     0   :  { %8 = vsyncpa [#allocation4], 0  ;;  %s3271_s0 = inlined_call_operand.vmem [shape: bf16[256,256], index: 0, kind: input, shape index: {}]   ;;  %s3272_s1 = inlined_call_operand.hbm [shape: bf16[2,256,512], index: 1, kind: input, shape index: {}]   ;;  %s3273_s2 = inlined_call_operand.hbm [shape: bf16[2,256,256], index: 2, kind: input, shape index: {}]   ;;  %s3274_s3 = inlined_call_operand.vmem [shape: bf16[256,256], index: 3, kind: output, shape index: {}]  }
   0x1   :  { %10 = vsyncpa [#allocation4 + $0x1], 0 }
   0x2   :  { %11 = vsyncpa [#allocation6], 0 }
   0x3   :  { %13 = vsyncpa [#allocation6 + $0x1], 0  ;;  %s2721_s12 = smov 0   ;;  %s2723_s13 = smov 0  }
   0x4   :  { %s2725_s14 = smov 0   ;;  %s2727_s15 = smov 0  }
   0x5   :  { %s2729_s16 = smov 0   ;;  %s2731_s17 = smov 0  }
   0x6   :  { %s2733_s18 = smov 0   ;;  %s2735_s19 = smov 0  }
   0x7 LB: > { %s1950_s20 = sadd.s32 4294967295, %s2692_s19   ;;  %s28_s21 = sadd.s32 1, %s2684_s17  ;;  %s2692_s19 = sphi %s2735_s19, %s19_s19   ;;  %s2688_s18 = sphi %s2733_s18, %s3287_s18   ;;  %s2684_s17 = sphi %s2731_s17, %s3286_s17   ;;  %s2680_s16 = sphi %s2729_s16, %s3285_s16   ;;  %s2676_s15 = sphi %s2727_s15, %s3284_s15   ;;  %s2672_s14 = sphi %s2725_s14, %s3283_s14   ;;  %s2668_s13 = sphi %s2723_s13, %s3282_s13   ;;  %s2664_s12 = sphi %s2721_s12, %s3281_s12  }
   0x8   : > { %p29_p0 = scmp.ge.s32.totalorder %s28_s21, 2  ;;  %s31_s22 = sadd.s32 1, %s2688_s18 }
   0x9   : > { %s64_s23 = sadd.s32 1, %s2672_s14  ;;  %p71_p1 = scmp.ne.s32.totalorder %s2672_s14, %s2668_s13 }
   0xa   : > { %s3289_s21 = smov (%p29_p0, %s28_s21), 0  ;;  %s3291_s22 = smov (!%p29_p0, %s31_s22), %s2688_s18 }
   0xb   : > { %s61_s24 = ssub.s32 %s2684_s17, %s3289_s21  ;;  %p72_p2 = scmp.eq.s32.totalorder %s2692_s19, 0 }
   0xc   : > { %p33_p3 = scmp.ge.s32.totalorder %s3291_s22, 2  ;;  %p62_p4 = scmp.eq.s32.totalorder %s61_s24, 0 }
   0xd   : > { %p2771_p5 = por %p72_p2, %p71_p1  ;;  %p77_p6 = scmp.ne.s32.totalorder %s2668_s13, %s2664_s12 }
   0xe   : > { %s3293_s22 = smov (%p33_p3, %s3291_s22), 0  ;;  %p78_p7 = scmp.eq.s32.totalorder %s1950_s20, 0 }
   0xf   : > { %s2779_s26 = scalar_select %p62_p4, %s2672_s14, %s64_s23  }
  0x10   : > { %p2196_p8 = scmp.lt.s32.totalorder %s2692_s19, 4  ;;  %s2783_s27 = sand.u32 1, %s2672_s14  }
  0x11   : > { %p2785_p9 = por %p78_p7, %p77_p6  ;;  %s1954_s29 = sshll.u32 %s2783_s27, 9 }
  0x12   : > { %s2133_s30 = sshll.u32 %s2684_s17, 13  ;;  %s167_s7 = scalar_lea.vmem [#allocation3], %s1954_s29 }
  0x13   : > { %s3277_s28 = scalar_select %p2785_p9, 1, 0 }
  0x14   : > { %s2794_s6 = scalar_lea.hbm %s3272_s1, %s2133_s30  ;;  %s174_s8 = sshll.u32 %s167_s7, 4  ;;  %s2802_s8 = int_to_ptr.vmem [resolvable:$true] %s174_s8 }
  0x15   : > { %p2798_p10 = pnand %p2196_p8, %p2771_p5  ;;  %s164_s10 = scalar_lea.sflag [#allocation4], %s2783_s27 }
  0x16   : > { %s2562_s11 = scalar_lea.hbm %s2794_s6, 8192  ;;  %s2567_s23 = scalar_lea.hbm %s3272_s1, 16384 }
  0x17   : > { %p2563_p11 = scmp.ne.s32.totalorder %s2794_s6, %s2562_s11  ;;  %p2564_p12 = pneg %p2798_p10 }
  0x18   : > { %p2568_p1 = scmp.lt.u32.totalorder %s2794_s6, %s3272_s1  ;;  %p2569_p2 = scmp.lt.u32.totalorder %s2567_s23, %s2562_s11 }
  0x19   : > { %p2565_p13 = pnand %p2564_p12, %p2563_p11  ;;  %p2571_p4 = scmp.lt.u32.totalorder %s2562_s11, %s2794_s6 }
  0x1a   : > { %p2570_p3 = por %p2569_p2, %p2568_p1 }
  0x1b   : > { %p2566_p0 = pneg %p2565_p13 }
  0x1c   : > { %p2572_p5 = por %p2571_p4, %p2570_p3 }
  0x1e   : > { %p2573_p6 = pnand %p2572_p5, %p2566_p0 }
  0x20   : > { %2576 = shalt.err (!%p2573_p6)
}
  0x21   : > { %s2577_s29 = scalar_lea.vmem %s2802_s8, 8192  ;;  %s2694_s30 = smov [#allocation3]  }
  0x22   : > { %p2578_p7 = scmp.ne.s32.totalorder %s2802_s8, %s2577_s29  ;;  %s2582_s4 = sshll.u32 %s2694_s30, 4  ;;  %s2583_s4 = int_to_ptr.vmem [resolvable:$false] %s2582_s4 }
  0x23   : > { %s2584_s5 = scalar_lea.vmem %s2583_s4, 16384  ;;  %p2585_p13 = scmp.lt.s32.totalorder %s2802_s8, %s2583_s4 }
  0x24   : > { %p2580_p8 = pnand %p2578_p7, %p2564_p12  ;;  %p2586_p1 = scmp.lt.s32.totalorder %s2584_s5, %s2577_s29 }
  0x26   : > { %p2581_p11 = pneg %p2580_p8  ;;  %p2587_p2 = por %p2586_p1, %p2585_p13 }
  0x28   : > { %p2588_p3 = pnand %p2587_p2, %p2581_p11 }
  0x2a   : > { %2591 = shalt.err (!%p2588_p3)
}
  0x2b   : > { %s2695_s7 = smov 256   ;;  %s2696_s11 = smov 16  }
  0x2c   : > { %2192 = dma.hbm_to_vmem [thread:$0]  (!%p2798_p10), %s2794_s6, 8192, %s2802_s8, %s164_s10, %s2695_s7, %s2695_s7, %s2696_s11  }
  0x2d   : > { %p1960_p0 = scmp.ge.s32.totalorder %s2692_s19, 1  ;;  %p203_p4 = scmp.lt.s32.totalorder %s2692_s19, 5 }
  0x2e   : > { %s1957_s12 = sshll.u32 %s2783_s27, 8  ;;  %s2134_s23 = sshll.u32 %s2684_s17, 12 }
  0x2f   : > { %p2835_p5 = pnand %p1960_p0, %p203_p4  ;;  %s188_s24 = scalar_lea.vmem [#allocation5], %s1957_s12 }
  0x30   : > { %s195_s25 = sshll.u32 %s188_s24, 4  ;;  %s2843_s4 = scalar_lea.hbm %s3273_s2, %s2134_s23  ;;  %s2845_s25 = int_to_ptr.vmem [resolvable:$true] %s195_s25 }
  0x31   : > { %s185_s6 = scalar_lea.sflag [#allocation6], %s2783_s27  ;;  %s2592_s8 = scalar_lea.hbm %s2843_s4, 4096 }
  0x32   : > { %p2593_p6 = scmp.ne.s32.totalorder %s2843_s4, %s2592_s8  ;;  %s2597_s7 = scalar_lea.hbm %s3273_s2, 8192 }
  0x33   : > { %p2598_p11 = scmp.lt.u32.totalorder %s2843_s4, %s3273_s2  ;;  %p2599_p13 = scmp.lt.u32.totalorder %s2597_s7, %s2592_s8 }
  0x34   : > { %p2595_p7 = pnand %p2593_p6, %p2564_p12  ;;  %p2601_p2 = scmp.lt.u32.totalorder %s2592_s8, %s2843_s4 }
  0x35   : > { %p2600_p1 = por %p2599_p13, %p2598_p11 }
  0x36   : > { %p2596_p8 = pneg %p2595_p7 }
  0x37   : > { %p2602_p3 = por %p2601_p2, %p2600_p1 }
  0x39   : > { %p2603_p0 = pnand %p2602_p3, %p2596_p8 }
  0x3b   : > { %2606 = shalt.err (!%p2603_p0)
}
  0x3c   : > { %s2607_s23 = scalar_lea.vmem %s2845_s25, 4096  ;;  %s2697_s24 = smov [#allocation5]  }
  0x3d   : > { %p2608_p4 = scmp.ne.s32.totalorder %s2845_s25, %s2607_s23  ;;  %s2612_s29 = sshll.u32 %s2697_s24, 4  ;;  %s2613_s29 = int_to_ptr.vmem [resolvable:$false] %s2612_s29 }
  0x3e   : > { %s2614_s30 = scalar_lea.vmem %s2613_s29, 8192  ;;  %p2615_p9 = scmp.lt.s32.totalorder %s2845_s25, %s2613_s29 }
  0x3f   : > { %p2610_p6 = pnand %p2608_p4, %p2564_p12  ;;  %p2616_p11 = scmp.lt.s32.totalorder %s2614_s30, %s2607_s23 }
  0x41   : > { %p2611_p7 = pneg %p2610_p6  ;;  %p2617_p13 = por %p2616_p11, %p2615_p9 }
  0x43   : > { %p2618_p1 = pnand %p2617_p13, %p2611_p7 }
  0x45   : > { %2621 = shalt.err (!%p2618_p1)
}
  0x46   : > { %s2698_s8 = smov 128   ;;  %s2699_s10 = smov 8  }
  0x47   : > { %2195 = dma.hbm_to_vmem [thread:$0]  (!%p2798_p10), %s2843_s4, 4096, %s2845_s25, %s185_s6, %s2698_s8, %s2698_s8, %s2699_s10  }
  0x48   : > { %207 = sbr.rel (%p2835_p5) target bundleno = 701 (0x2bd), region = 32  ;;  %s209_s5 = sand.u32 (!%p2835_p5), 1, %s2668_s13  }
  0x49   : > { %s1961_s7 = sshll.u32 (!%p2835_p5), %s209_s5, 9  ;;  %s210_s11 = scalar_lea.sflag (!%p2835_p5), [#allocation4], %s209_s5 }
  0x4a   : > { %s2876_s12 = scalar_lea.vmem (!%p2835_p5), [#allocation3], %s1961_s7  ;;  %p3280_p9 = scmp.ne.s32.totalorder (!%p2835_p5), %s3277_s28, 0 }
  0x4f   : > { %2655 = dma.done.wait (%p3280_p9), %s210_s11, 8192  }
  0x50   : > { %2657 = vsyncadd (%p3280_p9), %s210_s11, 4294959104  ;;  %s1962_s23 = sshll.u32 %s209_s5, 8  ;;  %s219_s9 = scalar_lea.sflag [#allocation6], %s209_s5 }
  0x51   : > { %s2882_s27 = scalar_lea.vmem [#allocation5], %s1962_s23 }
  0x52   : > { %2659 = dma.done.wait (%p3280_p9), %s219_s9, 4096  }
  0x53   : > { %2661 = vsyncadd (%p3280_p9), %s219_s9, 4294963200  ;;  %s1963_s20 = sshll.u32 %s2680_s16, 4  ;;  %p1969_p12 = scmp.ne.s32.totalorder %s2676_s15, 0 }
  0x54   : > { %p258_p10 = scmp.lt.s32.totalorder %s1963_s20, 31  ;;  %v2700_v0 = vmov (!%p1969_p12), 0.0  }
  0x55   : > { %274 = sbr.rel (%p1969_p12) target bundleno = 101 (0x65), region = 44  ;;  %275 = vst [vmem:[#allocation2] sm:$0xff] (!%p1969_p12), %v2700_v0  ;;  %276 = vst [vmem:[#allocation2 + $0x8] sm:$0xff] (!%p1969_p12), %v2700_v0 }
  0x56   : > { %s3295_s20 = smov (!%p258_p10, %s1963_s20), 31  ;;  %277 = vst [vmem:[#allocation2 + $0x10] sm:$0xff] (!%p1969_p12), %v2700_v0  ;;  %278 = vst [vmem:[#allocation2 + $0x18] sm:$0xff] (!%p1969_p12), %v2700_v0 }
  0x57   : > { %s2135_s25 = sshll.u32 %s3295_s20, 3  ;;  %279 = vst [vmem:[#allocation2 + $0x20] sm:$0xff] (!%p1969_p12), %v2700_v0  ;;  %280 = vst [vmem:[#allocation2 + $0x28] sm:$0xff] (!%p1969_p12), %v2700_v0 }
  0x58   : > { %s2892_s24 = scalar_lea.vmem %s3271_s0, %s2135_s25  ;;  %s2897_s8 = scalar_lea.vmem %s3274_s3, %s2135_s25  ;;  %281 = vst [vmem:[#allocation2 + $0x30] sm:$0xff] (!%p1969_p12), %v2700_v0  ;;  %282 = vst [vmem:[#allocation2 + $0x38] sm:$0xff] (!%p1969_p12), %v2700_v0 }
  0x59   : > { %283 = vst [vmem:[#allocation2 + $0x40] sm:$0xff] (!%p1969_p12), %v2700_v0  ;;  %284 = vst [vmem:[#allocation2 + $0x48] sm:$0xff] (!%p1969_p12), %v2700_v0 }
  0x5a   : > { %285 = vst [vmem:[#allocation2 + $0x50] sm:$0xff] (!%p1969_p12), %v2700_v0  ;;  %286 = vst [vmem:[#allocation2 + $0x58] sm:$0xff] (!%p1969_p12), %v2700_v0 }
  0x5b   : > { %287 = vst [vmem:[#allocation2 + $0x60] sm:$0xff] (!%p1969_p12), %v2700_v0  ;;  %288 = vst [vmem:[#allocation2 + $0x68] sm:$0xff] (!%p1969_p12), %v2700_v0 }
  0x5c   : > { %289 = vst [vmem:[#allocation2 + $0x70] sm:$0xff] %v2700_v0  ;;  %290 = vst [vmem:[#allocation2 + $0x78] sm:$0xff] %v2700_v0 }
  0x5d   : > { %291 = vst [vmem:[#allocation2 + $0x80] sm:$0xff] %v2700_v0  ;;  %292 = vst [vmem:[#allocation2 + $0x88] sm:$0xff] %v2700_v0 }
  0x5e   : > { %293 = vst [vmem:[#allocation2 + $0x90] sm:$0xff] %v2700_v0  ;;  %294 = vst [vmem:[#allocation2 + $0x98] sm:$0xff] %v2700_v0 }
  0x5f   : > { %295 = vst [vmem:[#allocation2 + $0xa0] sm:$0xff] %v2700_v0  ;;  %296 = vst [vmem:[#allocation2 + $0xa8] sm:$0xff] %v2700_v0 }
  0x60   : > { %297 = vst [vmem:[#allocation2 + $0xb0] sm:$0xff] %v2700_v0  ;;  %298 = vst [vmem:[#allocation2 + $0xb8] sm:$0xff] %v2700_v0 }
  0x61   : > { %299 = vst [vmem:[#allocation2 + $0xc0] sm:$0xff] %v2700_v0  ;;  %300 = vst [vmem:[#allocation2 + $0xc8] sm:$0xff] %v2700_v0 }
  0x62   : > { %301 = vst [vmem:[#allocation2 + $0xd0] sm:$0xff] %v2700_v0  ;;  %302 = vst [vmem:[#allocation2 + $0xd8] sm:$0xff] %v2700_v0 }
  0x63   : > { %303 = vst [vmem:[#allocation2 + $0xe0] sm:$0xff] %v2700_v0  ;;  %304 = vst [vmem:[#allocation2 + $0xe8] sm:$0xff] %v2700_v0 }
  0x64   : > { %305 = vst [vmem:[#allocation2 + $0xf0] sm:$0xff] %v2700_v0  ;;  %306 = vst [vmem:[#allocation2 + $0xf8] sm:$0xff] %v2700_v0 }
  0x65 PF: > { %v2266_v1 = vld [vmem:[%s2876_s12 + $0x4] ss:$16 sps:$4 sm:$0xff]   ;;  %v2268_v2 = vld [vmem:[%s2876_s12] ss:$16 sps:$4 sm:$0xff]   ;;  %v2287_v8 = vld [vmem:[%s2876_s12 + $0xc] ss:$16 sps:$4 sm:$0xff]  }
  0x66   : > { %787 = vmatprep.subr.bf16.mxu0 %v2266_v1  ;;  %v2269_v3 = vld [vmem:[%s2876_s12 + $0x24] ss:$16 sps:$4 sm:$0xff]   ;;  %v2271_v4 = vld [vmem:[%s2876_s12 + $0x20] ss:$16 sps:$4 sm:$0xff]   ;;  %v2289_v9 = vld [vmem:[%s2876_s12 + $0x8] ss:$16 sps:$4 sm:$0xff]   ;;  %900 = vmatprep.subr.bf16.mxu1 %v2287_v8 }
  0x67   : > { %788 = vmatpush1.bf16.msra.mxu0 %v2268_v2  ;;  %v2272_v5 = vld [vmem:[%s2876_s12 + $0x44] ss:$16 sps:$4 sm:$0xff]   ;;  %v2274_v6 = vld [vmem:[%s2876_s12 + $0x40] ss:$16 sps:$4 sm:$0xff]   ;;  %v2293_v12 = vld [vmem:[%s2876_s12 + $0x2c] ss:$16 sps:$4 sm:$0xff]   ;;  %901 = vmatpush1.bf16.msra.mxu1 %v2289_v9 }
  0x68   : > { %789 = vmatprep.subr.bf16.mxu0 %v2269_v3  ;;  %v2275_v7 = vld [vmem:[%s2876_s12 + $0x64] ss:$16 sps:$4 sm:$0xff]   ;;  %v2277_v10 = vld [vmem:[%s2876_s12 + $0x60] ss:$16 sps:$4 sm:$0xff]   ;;  %v2295_v13 = vld [vmem:[%s2876_s12 + $0x28] ss:$16 sps:$4 sm:$0xff]   ;;  %902 = vmatprep.subr.bf16.mxu1 %v2293_v12 }
  0x69   : > { %v2278_v11 = vld [vmem:[%s2876_s12 + $0x84] ss:$16 sps:$4 sm:$0xff]   ;;  %v2280_v14 = vld [vmem:[%s2876_s12 + $0x80] ss:$16 sps:$4 sm:$0xff]   ;;  %v2299_v15 = vld [vmem:[%s2876_s12 + $0x4c] ss:$16 sps:$4 sm:$0xff]  }
  0x6a   : > { %v2281_v16 = vld [vmem:[%s2876_s12 + $0xa4] ss:$16 sps:$4 sm:$0xff]   ;;  %v2301_v17 = vld [vmem:[%s2876_s12 + $0x48] ss:$16 sps:$4 sm:$0xff]   ;;  %v2305_v18 = vld [vmem:[%s2876_s12 + $0x6c] ss:$16 sps:$4 sm:$0xff]  }
  0x6b   : > { %790 = vmatpush1.bf16.msra.mxu0 %v2271_v4  ;;  %903 = vmatpush1.bf16.msra.mxu1 %v2295_v13  ;;  %v2283_v19 = vld [vmem:[%s2876_s12 + $0xa0] ss:$16 sps:$4 sm:$0xff]   ;;  %v2284_v20 = vld [vmem:[%s2876_s12 + $0xc4] ss:$16 sps:$4 sm:$0xff]   ;;  %v2307_v21 = vld [vmem:[%s2876_s12 + $0x68] ss:$16 sps:$4 sm:$0xff]  }
  0x6c   : > { %791 = vmatprep.subr.bf16.mxu0 %v2272_v5  ;;  %904 = vmatprep.subr.bf16.mxu1 %v2299_v15  ;;  %v2311_v22 = vld [vmem:[%s2876_s12 + $0x8c] ss:$16 sps:$4 sm:$0xff]   ;;  %v2286_v23 = vld [vmem:[%s2876_s12 + $0xc0] ss:$16 sps:$4 sm:$0xff]   ;;  %v2290_v24 = vld [vmem:[%s2876_s12 + $0xe4] ss:$16 sps:$4 sm:$0xff]  }
  0x6d   : > { %v2313_v25 = vld [vmem:[%s2876_s12 + $0x88] ss:$16 sps:$4 sm:$0xff]   ;;  %v2317_v26 = vld [vmem:[%s2876_s12 + $0xac] ss:$16 sps:$4 sm:$0xff]   ;;  %v2292_v27 = vld [vmem:[%s2876_s12 + $0xe0] ss:$16 sps:$4 sm:$0xff]  }
  0x6e   : > { %v2296_v28 = vld [vmem:[%s2876_s12 + $0x104] ss:$16 sps:$4 sm:$0xff]   ;;  %v2319_v29 = vld [vmem:[%s2876_s12 + $0xa8] ss:$16 sps:$4 sm:$0xff]   ;;  %v2323_v30 = vld [vmem:[%s2876_s12 + $0xcc] ss:$16 sps:$4 sm:$0xff]  }
  0x6f   : > { %792 = vmatpush1.bf16.msra.mxu0 %v2274_v6  ;;  %905 = vmatpush1.bf16.msra.mxu1 %v2301_v17  ;;  %v2298_v31 = vld [vmem:[%s2876_s12 + $0x100] ss:$16 sps:$4 sm:$0xff]   ;;  %v2302_v32 = vld [vmem:[%s2876_s12 + $0x124] ss:$16 sps:$4 sm:$0xff]   ;;  %v2325_v33 = vld [vmem:[%s2876_s12 + $0xc8] ss:$16 sps:$4 sm:$0xff]  }
  0x70   : > { %793 = vmatprep.subr.bf16.mxu0 %v2275_v7  ;;  %906 = vmatprep.subr.bf16.mxu1 %v2305_v18  ;;  %v2329_v34 = vld [vmem:[%s2876_s12 + $0xec] ss:$16 sps:$4 sm:$0xff]   ;;  %v2304_v35 = vld [vmem:[%s2876_s12 + $0x120] ss:$16 sps:$4 sm:$0xff]   ;;  %v2308_v37 = vld [vmem:[%s2876_s12 + $0x144] ss:$16 sps:$4 sm:$0xff]  }
  0x71   : > { %v2346_v36 = vld [vmem:[%s2892_s24 + $0x4] ss:$8 sps:$4 sm:$0xff]   ;;  %v2331_v38 = vld [vmem:[%s2876_s12 + $0xe8] ss:$16 sps:$4 sm:$0xff]   ;;  %v2310_v40 = vld [vmem:[%s2876_s12 + $0x140] ss:$16 sps:$4 sm:$0xff]  }
  0x72   : > { %819 = vmatprep.mubr.bf16.mxu0 %v2346_v36  ;;  %v2335_v39 = vld [vmem:[%s2876_s12 + $0x10c] ss:$16 sps:$4 sm:$0xff]   ;;  %932 = vmatprep.mubr.bf16.mxu1 %v2346_v36  ;;  %v2314_v41 = vld [vmem:[%s2876_s12 + $0x164] ss:$16 sps:$4 sm:$0xff]   ;;  %v2337_v42 = vld [vmem:[%s2876_s12 + $0x108] ss:$16 sps:$4 sm:$0xff]  }
  0x73   : > { %794 = vmatpush1.bf16.msra.mxu0 %v2277_v10  ;;  %907 = vmatpush1.bf16.msra.mxu1 %v2307_v21  ;;  %v2341_v43 = vld [vmem:[%s2876_s12 + $0x12c] ss:$16 sps:$4 sm:$0xff]   ;;  %v2316_v44 = vld [vmem:[%s2876_s12 + $0x160] ss:$16 sps:$4 sm:$0xff]   ;;  %v2320_v45 = vld [vmem:[%s2876_s12 + $0x184] ss:$16 sps:$4 sm:$0xff]  }
  0x74   : > { %795 = vmatprep.subr.bf16.mxu0 %v2278_v11  ;;  %908 = vmatprep.subr.bf16.mxu1 %v2311_v22  ;;  %v2343_v46 = vld [vmem:[%s2876_s12 + $0x128] ss:$16 sps:$4 sm:$0xff]   ;;  %v2347_v47 = vld [vmem:[%s2876_s12 + $0x14c] ss:$16 sps:$4 sm:$0xff]   ;;  %v2322_v48 = vld [vmem:[%s2876_s12 + $0x180] ss:$16 sps:$4 sm:$0xff]  }
  0x75   : > { %v2326_v49 = vld [vmem:[%s2876_s12 + $0x1a4] ss:$16 sps:$4 sm:$0xff]   ;;  %v2349_v50 = vld [vmem:[%s2876_s12 + $0x148] ss:$16 sps:$4 sm:$0xff]   ;;  %v2350_v51 = vld [vmem:[%s2876_s12 + $0x16c] ss:$16 sps:$4 sm:$0xff]  }
  0x76   : > { %v2328_v52 = vld [vmem:[%s2876_s12 + $0x1a0] ss:$16 sps:$4 sm:$0xff]   ;;  %v2332_v53 = vld [vmem:[%s2876_s12 + $0x1c4] ss:$16 sps:$4 sm:$0xff]   ;;  %v2352_v54 = vld [vmem:[%s2876_s12 + $0x168] ss:$16 sps:$4 sm:$0xff]  }
  0x77   : > { %796 = vmatpush1.bf16.msra.mxu0 %v2280_v14  ;;  %909 = vmatpush1.bf16.msra.mxu1 %v2313_v25  ;;  %v2356_v55 = vld [vmem:[%s2876_s12 + $0x18c] ss:$16 sps:$4 sm:$0xff]   ;;  %v2334_v56 = vld [vmem:[%s2876_s12 + $0x1c0] ss:$16 sps:$4 sm:$0xff]   ;;  %v2338_v57 = vld [vmem:[%s2876_s12 + $0x1e4] ss:$16 sps:$4 sm:$0xff]  }
  0x78   : > { %797 = vmatprep.subr.bf16.mxu0 %v2281_v16  ;;  %910 = vmatprep.subr.bf16.mxu1 %v2317_v26  ;;  %v2358_v58 = vld [vmem:[%s2876_s12 + $0x188] ss:$16 sps:$4 sm:$0xff]   ;;  %v2359_v59 = vld [vmem:[%s2876_s12 + $0x1ac] ss:$16 sps:$4 sm:$0xff]   ;;  %v2340_v60 = vld [vmem:[%s2876_s12 + $0x1e0] ss:$16 sps:$4 sm:$0xff]  }
  0x79   : > { %v2361_v61 = vld [vmem:[%s2876_s12 + $0x1a8] ss:$16 sps:$4 sm:$0xff]   ;;  %v2388_v63 = vld [vmem:[%s2882_s27 + $0x4] ss:$8 sps:$4 sm:$0xff]   ;;  %v2353_v0 = vld [vmem:[%s2892_s24 + $0x14] ss:$8 sps:$4 sm:$0xff]  }
  0x7a   : > { %v2344_v62 = vld [vmem:[%s2892_s24] ss:$8 sps:$4 sm:$0xff]   ;;  %v2365_v1 = vld [vmem:[%s2876_s12 + $0x1cc] ss:$16 sps:$4 sm:$0xff]   ;;  %v2389_v6 = vld [vmem:[%s2882_s27 + $0x10] ss:$8 sps:$4 sm:$0xff]  }
  0x7b   : > { %798 = vmatpush1.bf16.msra.mxu0 %v2283_v19  ;;  %911 = vmatpush1.bf16.msra.mxu1 %v2319_v29  ;;  %v2386_v2 = vld [vmem:[%s2882_s27] ss:$8 sps:$4 sm:$0xff]   ;;  %v2391_v3 = vld [vmem:[%s2882_s27 + $0x14] ss:$8 sps:$4 sm:$0xff]   ;;  %v2394_v7 = vld [vmem:[%s2882_s27 + $0x24] ss:$8 sps:$4 sm:$0xff]  }
  0x7c   : > { %799 = vmatprep.subr.bf16.mxu0 %v2284_v20  ;;  %912 = vmatprep.subr.bf16.mxu1 %v2323_v30  ;;  %v2367_v4 = vld [vmem:[%s2876_s12 + $0x1c8] ss:$16 sps:$4 sm:$0xff]   ;;  %v2368_v5 = vld [vmem:[%s2876_s12 + $0x1ec] ss:$16 sps:$4 sm:$0xff]   ;;  %p2114_p5 = scmp.ne.s32.totalorder %s2676_s15, 1 }
  0x7d   : > { %v2370_v8 = vld [vmem:[%s2876_s12 + $0x1e8] ss:$16 sps:$4 sm:$0xff]   ;;  %v2362_v10 = vld [vmem:[%s2892_s24 + $0x24] ss:$8 sps:$4 sm:$0xff]   ;;  %v2397_v12 = vld [vmem:[%s2882_s27 + $0x34] ss:$8 sps:$4 sm:$0xff]  }
  0x7e   : > { %v2355_v9 = vld [vmem:[%s2892_s24 + $0x10] ss:$8 sps:$4 sm:$0xff]   ;;  %v2392_v11 = vld [vmem:[%s2882_s27 + $0x20] ss:$8 sps:$4 sm:$0xff]   ;;  %v2400_v14 = vld [vmem:[%s2882_s27 + $0x44] ss:$8 sps:$4 sm:$0xff]  }
  0x7f   : > { %800 = vmatpush1.bf16.msra.mxu0 %v2286_v23  ;;  %913 = vmatpush1.bf16.msra.mxu1 %v2325_v33  ;;  %v2395_v13 = vld [vmem:[%s2882_s27 + $0x30] ss:$8 sps:$4 sm:$0xff]   ;;  %v2364_v15 = vld [vmem:[%s2892_s24 + $0x20] ss:$8 sps:$4 sm:$0xff]   ;;  %v2371_v16 = vld [vmem:[%s2892_s24 + $0x34] ss:$8 sps:$4 sm:$0xff]  }
  0x80   : > { %801 = vmatprep.subr.bf16.mxu0 %v2290_v24  ;;  %914 = vmatprep.subr.bf16.mxu1 %v2329_v34  ;;  %v2398_v17 = vld [vmem:[%s2882_s27 + $0x40] ss:$8 sps:$4 sm:$0xff]   ;;  %v2403_v18 = vld [vmem:[%s2882_s27 + $0x54] ss:$8 sps:$4 sm:$0xff]   ;;  %v2401_v19 = vld [vmem:[%s2882_s27 + $0x50] ss:$8 sps:$4 sm:$0xff]  }
  0x81   : > { %v2406_v20 = vld [vmem:[%s2882_s27 + $0x64] ss:$8 sps:$4 sm:$0xff]   ;;  %v2373_v21 = vld [vmem:[%s2892_s24 + $0x30] ss:$8 sps:$4 sm:$0xff]   ;;  %v2404_v23 = vld [vmem:[%s2882_s27 + $0x60] ss:$8 sps:$4 sm:$0xff]  }
  0x82   : > { %v2374_v22 = vld [vmem:[%s2892_s24 + $0x44] ss:$8 sps:$4 sm:$0xff]   ;;  %v2376_v24 = vld [vmem:[%s2892_s24 + $0x40] ss:$8 sps:$4 sm:$0xff]   ;;  %v2377_v25 = vld [vmem:[%s2892_s24 + $0x54] ss:$8 sps:$4 sm:$0xff]  }
  0x83   : > { %802 = vmatpush1.bf16.msra.mxu0 %v2292_v27  ;;  %915 = vmatpush1.bf16.msra.mxu1 %v2331_v38  ;;  %v2379_v26 = vld [vmem:[%s2892_s24 + $0x50] ss:$8 sps:$4 sm:$0xff]   ;;  %v2380_v27 = vld [vmem:[%s2892_s24 + $0x64] ss:$8 sps:$4 sm:$0xff]   ;;  %v2383_v29 = vld [vmem:[%s2892_s24 + $0x74] ss:$8 sps:$4 sm:$0xff]  }
  0x84   : > { %803 = vmatprep.subr.bf16.mxu0 %v2296_v28  ;;  %916 = vmatprep.subr.bf16.mxu1 %v2335_v39  ;;  %v2382_v28 = vld [vmem:[%s2892_s24 + $0x60] ss:$8 sps:$4 sm:$0xff]   ;;  %v2385_v30 = vld [vmem:[%s2892_s24 + $0x70] ss:$8 sps:$4 sm:$0xff]   ;;  %v2412_v33 = vld [vmem:[%s2882_s27 + $0x84] ss:$8 sps:$4 sm:$0xff]  }
  0x85   : > { %v2410_v34 = vld [vmem:[%s2882_s27 + $0x80] ss:$8 sps:$4 sm:$0xff]   ;;  %v2413_v36 = vld [vmem:[%s2882_s27 + $0x90] ss:$8 sps:$4 sm:$0xff]   ;;  %v2421_v39 = vld [vmem:[%s2882_s27 + $0xb4] ss:$8 sps:$4 sm:$0xff]  }
  0x86   : > { %v2416_v38 = vld [vmem:[%s2882_s27 + $0xa0] ss:$8 sps:$4 sm:$0xff]  }
  0x87   : > { %804 = vmatpush1.bf16.msra.mxu0 %v2298_v31  ;;  %917 = vmatpush1.bf16.msra.mxu1 %v2337_v42  ;;  %v2409_v31 = vld [vmem:[%s2882_s27 + $0x74] ss:$8 sps:$4 sm:$0xff]   ;;  %v2422_v42 = vld [vmem:[%s2882_s27 + $0xc0] ss:$8 sps:$4 sm:$0xff]  }
  0x88   : > { %805 = vmatprep.subr.bf16.mxu0 %v2302_v32  ;;  %918 = vmatprep.subr.bf16.mxu1 %v2341_v43  ;;  %v2407_v32 = vld [vmem:[%s2882_s27 + $0x70] ss:$8 sps:$4 sm:$0xff]   ;;  %v2427_v43 = vld [vmem:[%s2882_s27 + $0xd4] ss:$8 sps:$4 sm:$0xff]  }
  0x8b   : > { %806 = vmatpush1.bf16.msra.mxu0 %v2304_v35  ;;  %919 = vmatpush1.bf16.msra.mxu1 %v2343_v46  ;;  %v2415_v35 = vld [vmem:[%s2882_s27 + $0x94] ss:$8 sps:$4 sm:$0xff]   ;;  %v2428_v46 = vld [vmem:[%s2882_s27 + $0xe0] ss:$8 sps:$4 sm:$0xff]  }
  0x8c   : > { %807 = vmatprep.subr.bf16.mxu0 %v2308_v37  ;;  %920 = vmatprep.subr.bf16.mxu1 %v2347_v47  ;;  %v2418_v37 = vld [vmem:[%s2882_s27 + $0xa4] ss:$8 sps:$4 sm:$0xff]   ;;  %v2433_v47 = vld [vmem:[%s2882_s27 + $0xf4] ss:$8 sps:$4 sm:$0xff]  }
  0x8f   : > { %808 = vmatpush1.bf16.msra.mxu0 %v2310_v40  ;;  %921 = vmatpush1.bf16.msra.mxu1 %v2349_v50  ;;  %v2419_v40 = vld [vmem:[%s2882_s27 + $0xb0] ss:$8 sps:$4 sm:$0xff]  }
  0x90   : > { %809 = vmatprep.subr.bf16.mxu0 %v2314_v41  ;;  %922 = vmatprep.subr.bf16.mxu1 %v2350_v51  ;;  %v2424_v41 = vld [vmem:[%s2882_s27 + $0xc4] ss:$8 sps:$4 sm:$0xff]  }
  0x93   : > { %810 = vmatpush1.bf16.msra.mxu0 %v2316_v44  ;;  %923 = vmatpush1.bf16.msra.mxu1 %v2352_v54  ;;  %v2425_v44 = vld [vmem:[%s2882_s27 + $0xd0] ss:$8 sps:$4 sm:$0xff]  }
  0x94   : > { %811 = vmatprep.subr.bf16.mxu0 %v2320_v45  ;;  %924 = vmatprep.subr.bf16.mxu1 %v2356_v55  ;;  %v2430_v45 = vld [vmem:[%s2882_s27 + $0xe4] ss:$8 sps:$4 sm:$0xff]  }
  0x97   : > { %812 = vmatpush1.bf16.msra.mxu0 %v2322_v48  ;;  %925 = vmatpush1.bf16.msra.mxu1 %v2358_v58  ;;  %v2431_v48 = vld [vmem:[%s2882_s27 + $0xf0] ss:$8 sps:$4 sm:$0xff]  }
  0x98   : > { %813 = vmatprep.subr.bf16.mxu0 %v2326_v49  ;;  %926 = vmatprep.subr.bf16.mxu1 %v2359_v59 }
  0x9b   : > { %814 = vmatpush1.bf16.msra.mxu0 %v2328_v52  ;;  %927 = vmatpush1.bf16.msra.mxu1 %v2361_v61 }
  0x9c   : > { %815 = vmatprep.subr.bf16.mxu0 %v2332_v53  ;;  %928 = vmatprep.subr.bf16.mxu1 %v2365_v1 }
  0x9f   : > { %816 = vmatpush1.bf16.msra.mxu0 %v2334_v56  ;;  %929 = vmatpush1.bf16.msra.mxu1 %v2367_v4 }
  0xa0   : > { %817 = vmatprep.subr.bf16.mxu0 %v2338_v57  ;;  %930 = vmatprep.subr.bf16.mxu1 %v2368_v5 }
  0xa3   : > { %818 = vmatpush1.bf16.msra.mxu0 %v2340_v60  ;;  %931 = vmatpush1.bf16.msra.mxu1 %v2370_v8 }
  0xa4   : > { %1509 = vmatprep.subr.bf16.mxu0 %v2388_v63  ;;  %2153 = vmatprep.subr.bf16.mxu1 %v2388_v63 }
  0xa6   : > { %820 = vmatmul.mubr.bf16.vlgmr.msra.gmra.mrb[0].mxu0 %v2344_v62  ;;  %933 = vmatmul.mubr.bf16.vlgmr.msra.gmra.mrb[0].mxu1 %v2344_v62 }
  0xa7   : > { %829 = vmatprep.mubr.bf16.mxu0 %v2353_v0  ;;  %1510 = vmatpush1.bf16.msra.mxu0 %v2386_v2 }
  0xa8   : > { %1511 = vmatprep.subr.bf16.mxu0 %v2391_v3  ;;  %942 = vmatprep.mubr.bf16.mxu1 %v2353_v0 }
  0xa9   : > { %2169 = vmatpush1.bf16.msra.mxu1 %v2386_v2 }
  0xaa   : > { %2154 = vmatprep.subr.bf16.mxu1 %v2391_v3 }
  0xab   : > { %1512 = vmatpush1.bf16.msra.mxu0 %v2389_v6 }
  0xac   : > { %1513 = vmatprep.subr.bf16.mxu0 %v2394_v7 }
  0xad   : > { %2170 = vmatpush1.bf16.msra.mxu1 %v2389_v6 }
  0xae   : > { %830 = vmatmul.mubr.bf16.gmra.mrb[4].mxu0 %v2355_v9  ;;  %2155 = vmatprep.subr.bf16.mxu1 %v2394_v7 }
  0xaf   : > { %839 = vmatprep.mubr.bf16.mxu0 %v2362_v10  ;;  %1514 = vmatpush1.bf16.msra.mxu0 %v2392_v11 }
  0xb0   : > { %1515 = vmatprep.subr.bf16.mxu0 %v2397_v12  ;;  %943 = vmatmul.mubr.bf16.gmra.mrb[4].mxu1 %v2355_v9 }
  0xb1   : > { %952 = vmatprep.mubr.bf16.mxu1 %v2362_v10  ;;  %2171 = vmatpush1.bf16.msra.mxu1 %v2392_v11 }
  0xb2   : > { %2156 = vmatprep.subr.bf16.mxu1 %v2397_v12 }
  0xb3   : > { %1516 = vmatpush1.bf16.msra.mxu0 %v2395_v13 }
  0xb4   : > { %1517 = vmatprep.subr.bf16.mxu0 %v2400_v14 }
  0xb5   : > { %2172 = vmatpush1.bf16.msra.mxu1 %v2395_v13 }
  0xb6   : > { %840 = vmatmul.mubr.bf16.gmra.mrb[8].mxu0 %v2364_v15  ;;  %2157 = vmatprep.subr.bf16.mxu1 %v2400_v14 }
  0xb7   : > { %849 = vmatprep.mubr.bf16.mxu0 %v2371_v16  ;;  %1518 = vmatpush1.bf16.msra.mxu0 %v2398_v17 }
  0xb8   : > { %1519 = vmatprep.subr.bf16.mxu0 %v2403_v18  ;;  %953 = vmatmul.mubr.bf16.gmra.mrb[8].mxu1 %v2364_v15 }
  0xb9   : > { %962 = vmatprep.mubr.bf16.mxu1 %v2371_v16  ;;  %2173 = vmatpush1.bf16.msra.mxu1 %v2398_v17 }
  0xba   : > { %2158 = vmatprep.subr.bf16.mxu1 %v2403_v18 }
  0xbb   : > { %1520 = vmatpush1.bf16.msra.mxu0 %v2401_v19 }
  0xbc   : > { %1521 = vmatprep.subr.bf16.mxu0 %v2406_v20 }
  0xbd   : > { %2174 = vmatpush1.bf16.msra.mxu1 %v2401_v19 }
  0xbe   : > { %850 = vmatmul.mubr.bf16.gmra.mrb[12].mxu0 %v2373_v21  ;;  %2159 = vmatprep.subr.bf16.mxu1 %v2406_v20 }
  0xbf   : > { %859 = vmatprep.mubr.bf16.mxu0 %v2374_v22  ;;  %1522 = vmatpush1.bf16.msra.mxu0 %v2404_v23 }
  0xc0   : > { %963 = vmatmul.mubr.bf16.gmra.mrb[12].mxu1 %v2373_v21  ;;  %1523 = vmatprep.subr.bf16.mxu0 %v2409_v31 }
  0xc1   : > { %972 = vmatprep.mubr.bf16.mxu1 %v2374_v22  ;;  %2175 = vmatpush1.bf16.msra.mxu1 %v2404_v23 }
  0xc2   : > { %2160 = vmatprep.subr.bf16.mxu1 %v2409_v31 }
  0xc3   : > { %1524 = vmatpush1.bf16.msra.mxu0 %v2407_v32 }
  0xc4   : > { %1525 = vmatprep.subr.bf16.mxu0 %v2412_v33 }
  0xc5   : > { %2176 = vmatpush1.bf16.msra.mxu1 %v2407_v32 }
  0xc6   : > { %860 = vmatmul.mubr.bf16.gmra.mrb[16].mxu0 %v2376_v24  ;;  %2161 = vmatprep.subr.bf16.mxu1 %v2412_v33 }
  0xc7   : > { %869 = vmatprep.mubr.bf16.mxu0 %v2377_v25  ;;  %1526 = vmatpush1.bf16.msra.mxu0 %v2410_v34 }
  0xc8   : > { %973 = vmatmul.mubr.bf16.gmra.mrb[16].mxu1 %v2376_v24  ;;  %1527 = vmatprep.subr.bf16.mxu0 %v2415_v35 }
  0xc9   : > { %982 = vmatprep.mubr.bf16.mxu1 %v2377_v25  ;;  %2177 = vmatpush1.bf16.msra.mxu1 %v2410_v34 }
  0xca   : > { %2162 = vmatprep.subr.bf16.mxu1 %v2415_v35 }
  0xcb   : > { %1528 = vmatpush1.bf16.msra.mxu0 %v2413_v36 }
  0xcc   : > { %1529 = vmatprep.subr.bf16.mxu0 %v2418_v37 }
  0xcd   : > { %2178 = vmatpush1.bf16.msra.mxu1 %v2413_v36 }
  0xce   : > { %870 = vmatmul.mubr.bf16.gmra.mrb[20].mxu0 %v2379_v26  ;;  %2163 = vmatprep.subr.bf16.mxu1 %v2418_v37 }
  0xcf   : > { %879 = vmatprep.mubr.bf16.mxu0 %v2380_v27  ;;  %1530 = vmatpush1.bf16.msra.mxu0 %v2416_v38 }
  0xd0   : > { %983 = vmatmul.mubr.bf16.gmra.mrb[20].mxu1 %v2379_v26  ;;  %1531 = vmatprep.subr.bf16.mxu0 %v2421_v39 }
  0xd1   : > { %992 = vmatprep.mubr.bf16.mxu1 %v2380_v27  ;;  %2179 = vmatpush1.bf16.msra.mxu1 %v2416_v38 }
  0xd2   : > { %2164 = vmatprep.subr.bf16.mxu1 %v2421_v39 }
  0xd3   : > { %1532 = vmatpush1.bf16.msra.mxu0 %v2419_v40 }
  0xd4   : > { %1533 = vmatprep.subr.bf16.mxu0 %v2424_v41 }
  0xd5   : > { %2180 = vmatpush1.bf16.msra.mxu1 %v2419_v40 }
  0xd6   : > { %880 = vmatmul.mubr.bf16.gmra.mrb[24].mxu0 %v2382_v28  ;;  %2165 = vmatprep.subr.bf16.mxu1 %v2424_v41 }
  0xd7   : > { %889 = vmatprep.mubr.bf16.mxu0 %v2383_v29  ;;  %1534 = vmatpush1.bf16.msra.mxu0 %v2422_v42 }
  0xd8   : > { %993 = vmatmul.mubr.bf16.gmra.mrb[24].mxu1 %v2382_v28  ;;  %1535 = vmatprep.subr.bf16.mxu0 %v2427_v43 }
  0xd9   : > { %1002 = vmatprep.mubr.bf16.mxu1 %v2383_v29  ;;  %2181 = vmatpush1.bf16.msra.mxu1 %v2422_v42 }
  0xda   : > { %2166 = vmatprep.subr.bf16.mxu1 %v2427_v43 }
  0xdb   : > { %1536 = vmatpush1.bf16.msra.mxu0 %v2425_v44 }
  0xdc   : > { %1537 = vmatprep.subr.bf16.mxu0 %v2430_v45 }
  0xdd   : > { %2182 = vmatpush1.bf16.msra.mxu1 %v2425_v44 }
  0xde   : > { %890 = vmatmul.mubr.bf16.gmra.mrb[28].mxu0 %v2385_v30  ;;  %2167 = vmatprep.subr.bf16.mxu1 %v2430_v45 }
  0xdf   : > { %1538 = vmatpush1.bf16.msra.mxu0 %v2428_v46 }
  0xe0   : > { %1003 = vmatmul.mubr.bf16.gmra.mrb[28].mxu1 %v2385_v30  ;;  %1539 = vmatprep.subr.bf16.mxu0 %v2433_v47 }
  0xe1   : > { %2183 = vmatpush1.bf16.msra.mxu1 %v2428_v46 }
  0xe2   : > { %2168 = vmatprep.subr.bf16.mxu1 %v2433_v47 }
  0xe3   : > { %1540 = vmatpush1.bf16.msra.mxu0 %v2431_v48 }
  0xe5   : > { %2184 = vmatpush1.bf16.msra.mxu1 %v2431_v48 }
 0x179   : > { %v3012_v49 = vpop.f32.mrb[0].mxu0  ;;  %v3032_v62 = vpop.f32.mrb[0].mxu1 }
 0x17a   : > { %v2050_v50 = vmul.f32 -1.442695, %v3012_v49  ;;  %v3015_v51 = vpop.f32.mrb[1].mxu0  ;;  %v3037_v1 = vpop.f32.mrb[1].mxu1 }
 0x17b   : > { %v2051_v52 = vmul.f32 -1.442695, %v3015_v51  ;;  %v3018_v53 = vpop.f32.mrb[2].mxu0  ;;  %v3040_v3 = vpop.f32.mrb[2].mxu1 }
 0x17c   : > { %2434 = vpow2.f32 %v2050_v50  ;;  %v2052_v54 = vmul.f32 -1.442695, %v3018_v53  ;;  %v3021_v55 = vpop.f32.mrb[3].mxu0  ;;  %v3042_v5 = vpop.f32.mrb[3].mxu1 }
 0x17d   : > { %2436 = vpow2.f32 %v2051_v52  ;;  %v2053_v56 = vmul.f32 -1.442695, %v3021_v55 }
 0x17e   : > { %2438 = vpow2.f32 %v2052_v54 }
 0x17f   : > { %2440 = vpow2.f32 %v2053_v56 }
 0x181   : > { %v3024_v57 = vpop.f32.mrb[4].mxu0 }
 0x182   : > { %v2054_v58 = vmul.f32 -1.442695, %v3024_v57  ;;  %v3027_v59 = vpop.f32.mrb[5].mxu0 }
 0x183   : > { %v2055_v60 = vmul.f32 -1.442695, %v3027_v59  ;;  %v3030_v61 = vpop.f32.mrb[6].mxu0  ;;  %v3052_v18 = vpop.f32.mrb[4].mxu1 }
 0x184   : > { %2442 = vpow2.f32 %v2054_v58  ;;  %v2056_v63 = vmul.f32 -1.442695, %v3030_v61  ;;  %v3035_v0 = vpop.f32.mrb[7].mxu0  ;;  %v3057_v21 = vpop.f32.mrb[5].mxu1 }
 0x185   : > { %2444 = vpow2.f32 %v2055_v60  ;;  %v2057_v2 = vmul.f32 -1.442695, %v3035_v0  ;;  %v3060_v23 = vpop.f32.mrb[6].mxu1 }
 0x186   : > { %v2435_v4 = vpop.eup %2434  ;;  %2446 = vpow2.f32 %v2056_v63  ;;  %v3062_v25 = vpop.f32.mrb[7].mxu1 }
 0x187   : > { %v2437_v6 = vpop.eup %2436  ;;  %v1109_v7 = vadd.f32 1.0, %v2435_v4  ;;  %2448 = vpow2.f32 %v2057_v2 }
 0x188   : > { %v2439_v8 = vpop.eup %2438  ;;  %v1110_v9 = vadd.f32 1.0, %v2437_v6 }
 0x189   : > { %v2441_v10 = vpop.eup %2440  ;;  %2450 = vrcp.f32 %v1109_v7  ;;  %v1111_v11 = vadd.f32 1.0, %v2439_v8  ;;  %v3044_v12 = vpop.f32.mrb[8].mxu0 }
 0x18a   : > { %2452 = vrcp.f32 %v1110_v9  ;;  %v1112_v13 = vadd.f32 1.0, %v2441_v10  ;;  %v2058_v14 = vmul.f32 -1.442695, %v3044_v12  ;;  %v3047_v15 = vpop.f32.mrb[9].mxu0 }
 0x18b   : > { %2454 = vrcp.f32 %v1111_v11  ;;  %v2059_v16 = vmul.f32 -1.442695, %v3047_v15  ;;  %v3050_v17 = vpop.f32.mrb[10].mxu0  ;;  %v3072_v39 = vpop.f32.mrb[8].mxu1 }
 0x18c   : > { %2456 = vrcp.f32 %v1112_v13  ;;  %v2060_v19 = vmul.f32 -1.442695, %v3050_v17  ;;  %v3055_v20 = vpop.f32.mrb[11].mxu0  ;;  %v3078_v44 = vpop.f32.mrb[9].mxu1 }
 0x18d   : > { %2458 = vpow2.f32 %v2058_v14  ;;  %v2061_v22 = vmul.f32 -1.442695, %v3055_v20  ;;  %v3082_v48 = vpop.f32.mrb[10].mxu1 }
 0x18e   : > { %v2443_v24 = vpop.eup %2442  ;;  %2460 = vpow2.f32 %v2059_v16  ;;  %v3086_v54 = vpop.f32.mrb[11].mxu1 }
 0x18f   : > { %v2445_v26 = vpop.eup %2444  ;;  %v1113_v27 = vadd.f32 1.0, %v2443_v24  ;;  %2462 = vpow2.f32 %v2060_v19 }
 0x190   : > { %v2447_v28 = vpop.eup %2446  ;;  %v1114_v29 = vadd.f32 1.0, %v2445_v26  ;;  %2464 = vpow2.f32 %v2061_v22 }
 0x191   : > { %v2449_v30 = vpop.eup %2448  ;;  %2466 = vrcp.f32 %v1113_v27  ;;  %v1115_v31 = vadd.f32 1.0, %v2447_v28  ;;  %v3064_v32 = vpop.f32.mrb[12].mxu0 }
 0x192   : > { %2468 = vrcp.f32 %v1114_v29  ;;  %v1116_v33 = vadd.f32 1.0, %v2449_v30  ;;  %v2062_v34 = vmul.f32 -1.442695, %v3064_v32  ;;  %v3067_v35 = vpop.f32.mrb[13].mxu0 }
 0x193   : > { %v2451_v36 = vpop.eup %2450  ;;  %2470 = vrcp.f32 %v1115_v31  ;;  %v2063_v37 = vmul.f32 -1.442695, %v3067_v35  ;;  %v3070_v38 = vpop.f32.mrb[14].mxu0 }
 0x194   : > { %v2453_v40 = vpop.eup %2452  ;;  %v1205_v41 = vmul.f32 %v2451_v36, %v3012_v49  ;;  %2472 = vrcp.f32 %v1116_v33  ;;  %v2064_v42 = vmul.f32 -1.442695, %v3070_v38  ;;  %v3076_v43 = vpop.f32.mrb[15].mxu0 }
 0x195   : > { %v2455_v45 = vpop.eup %2454  ;;  %v1206_v46 = vmul.f32 %v2453_v40, %v3015_v51  ;;  %2474 = vpow2.f32 %v2062_v34  ;;  %v2065_v47 = vmul.f32 -1.442695, %v3076_v43  ;;  %v3100_v16 = vpop.f32.mrb[12].mxu1 }
 0x196   : > { %v2457_v50 = vpop.eup %2456  ;;  %v1207_v52 = vmul.f32 %v2455_v45, %v3018_v53  ;;  %2476 = vpow2.f32 %v2063_v37  ;;  %v1237_v49 = vmul.f32 %v1205_v41, %v3032_v62  ;;  %v3106_v26 = vpop.f32.mrb[13].mxu1 }
 0x197   : > { %v2459_v56 = vpop.eup %2458  ;;  %v1208_v58 = vmul.f32 %v2457_v50, %v3021_v55  ;;  %2478 = vpow2.f32 %v2064_v42  ;;  %v1238_v60 = vmul.f32 %v1206_v46, %v3037_v1  ;;  %v3110_v30 = vpop.f32.mrb[14].mxu1 }
 0x198   : > { %v2461_v51 = vpop.eup %2460  ;;  %v1117_v63 = vadd.f32 1.0, %v2459_v56  ;;  %2480 = vpow2.f32 %v2065_v47  ;;  %v1239_v2 = vmul.f32 %v1207_v52, %v3040_v3  ;;  %v3114_v34 = vpop.f32.mrb[15].mxu1 }
 0x199   : > { %v2463_v4 = vpop.eup %2462  ;;  %v1118_v6 = vadd.f32 1.0, %v2461_v51  ;;  %v1240_v53 = vmul.f32 %v1208_v58, %v3042_v5  ;;  %v3092_v7 = vpop.f32.mrb[16].mxu0 }
 0x19a   : > { %v2465_v62 = vpop.eup %2464  ;;  %2482 = vrcp.f32 %v1117_v63  ;;  %v1119_v8 = vadd.f32 1.0, %v2463_v4  ;;  %v1301_v9 = vpack.c.bf16 %v1239_v2, %v1237_v49  ;;  %v2066_v55 = vmul.f32 -1.442695, %v3092_v7  ;;  %v3095_v10 = vpop.f32.mrb[17].mxu0 }
 0x19b   : > { %v2467_v1 = vpop.eup %2466  ;;  %2484 = vrcp.f32 %v1118_v6  ;;  %v1120_v11 = vadd.f32 1.0, %v2465_v62  ;;  %v1302_v13 = vpack.c.bf16 %v1240_v53, %v1238_v60  ;;  %v2067_v3 = vmul.f32 -1.442695, %v3095_v10  ;;  %v3098_v14 = vpop.f32.mrb[18].mxu0 }
 0x19c   : > { %v2469_v5 = vpop.eup %2468  ;;  %v1209_v19 = vmul.f32 %v2467_v1, %v3024_v57  ;;  %2486 = vrcp.f32 %v1119_v8  ;;  %v2068_v22 = vmul.f32 -1.442695, %v3098_v14  ;;  %v3104_v24 = vpop.f32.mrb[19].mxu0 }
 0x19d   : > { %v2471_v27 = vpop.eup %2470  ;;  %v1210_v28 = vmul.f32 %v2469_v5, %v3027_v59  ;;  %2488 = vrcp.f32 %v1120_v11  ;;  %v2069_v29 = vmul.f32 -1.442695, %v3104_v24  ;;  %1541 = vmatprep.mubr.bf16.mxu0 %v1302_v13  ;;  %v3128_v60 = vpop.f32.mrb[16].mxu1 }
 0x19e   : > { %v2473_v31 = vpop.eup %2472  ;;  %v1211_v33 = vmul.f32 %v2471_v27, %v3030_v61  ;;  %2490 = vpow2.f32 %v2066_v55  ;;  %v1241_v57 = vmul.f32 %v1209_v19, %v3052_v18  ;;  %1542 = vmatmul.mubr.bf16.vlgmr.msra.gmra.mrb[32].mxu0 %v1301_v9  ;;  %v3133_v2 = vpop.f32.mrb[17].mxu1 }
 0x19f   : > { %v2475_v36 = vpop.eup %2474  ;;  %v1212_v37 = vmul.f32 %v2473_v31, %v3035_v0  ;;  %2492 = vpow2.f32 %v2067_v3  ;;  %v1242_v59 = vmul.f32 %v1210_v28, %v3057_v21  ;;  %v3137_v62 = vpop.f32.mrb[18].mxu1 }
 0x1a0   : > { %v2477_v40 = vpop.eup %2476  ;;  %v1121_v41 = vadd.f32 1.0, %v2475_v36  ;;  %2494 = vpow2.f32 %v2068_v22  ;;  %v1243_v42 = vmul.f32 %v1211_v33, %v3060_v23  ;;  %v3140_v55 = vpop.f32.mrb[19].mxu1 }
 0x1a1   : > { %v2479_v45 = vpop.eup %2478  ;;  %v1122_v46 = vadd.f32 1.0, %v2477_v40  ;;  %2496 = vpow2.f32 %v2069_v29  ;;  %v1244_v61 = vmul.f32 %v1212_v37, %v3062_v25  ;;  %v3120_v18 = vpop.f32.mrb[20].mxu0 }
 0x1a2   : > { %v2481_v47 = vpop.eup %2480  ;;  %2498 = vrcp.f32 %v1121_v41  ;;  %v1123_v50 = vadd.f32 1.0, %v2479_v45  ;;  %v1303_v52 = vpack.c.bf16 %v1243_v42, %v1241_v57  ;;  %v2070_v0 = vmul.f32 -1.442695, %v3120_v18  ;;  %v3123_v49 = vpop.f32.mrb[21].mxu0 }
 0x1a3   : > { %2500 = vrcp.f32 %v1122_v46  ;;  %v1124_v21 = vadd.f32 1.0, %v2481_v47  ;;  %v1304_v56 = vpack.c.bf16 %v1244_v61, %v1242_v59  ;;  %v2071_v23 = vmul.f32 -1.442695, %v3123_v49  ;;  %v3126_v58 = vpop.f32.mrb[22].mxu0  ;;  %v3155_v36 = vpop.f32.mrb[20].mxu1 }
 0x1a4   : > { %v2483_v25 = vpop.eup %2482  ;;  %2502 = vrcp.f32 %v1123_v50  ;;  %v2072_v51 = vmul.f32 -1.442695, %v3126_v58  ;;  %v3131_v63 = vpop.f32.mrb[23].mxu0 }
 0x1a5   : > { %v2485_v4 = vpop.eup %2484  ;;  %v1213_v6 = vmul.f32 %v2483_v25, %v3044_v12  ;;  %2504 = vrcp.f32 %v1124_v21  ;;  %v2073_v53 = vmul.f32 -1.442695, %v3131_v63  ;;  %1551 = vmatprep.mubr.bf16.mxu0 %v1304_v56 }
 0x1a6   : > { %v2487_v8 = vpop.eup %2486  ;;  %v1214_v9 = vmul.f32 %v2485_v4, %v3047_v15  ;;  %2506 = vpow2.f32 %v2070_v0  ;;  %1552 = vmatmul.mubr.bf16.gmra.mrb[36].mxu0 %v1303_v52 }
 0x1a7   : > { %v2489_v1 = vpop.eup %2488  ;;  %v1215_v11 = vmul.f32 %v2487_v8, %v3050_v17  ;;  %2508 = vpow2.f32 %v2071_v23  ;;  %v1245_v13 = vmul.f32 %v1213_v6, %v3072_v39 }
 0x1a8   : > { %v2491_v12 = vpop.eup %2490  ;;  %v1216_v3 = vmul.f32 %v2489_v1, %v3055_v20  ;;  %2510 = vpow2.f32 %v2072_v51  ;;  %v1246_v5 = vmul.f32 %v1214_v9, %v3078_v44 }
 0x1a9   : > { %v2493_v19 = vpop.eup %2492  ;;  %v1125_v22 = vadd.f32 1.0, %v2491_v12  ;;  %2512 = vpow2.f32 %v2073_v53  ;;  %v1247_v15 = vmul.f32 %v1215_v11, %v3082_v48  ;;  %v3147_v27 = vpop.f32.mrb[24].mxu0 }
 0x1aa   : > { %v2495_v28 = vpop.eup %2494  ;;  %v1126_v29 = vadd.f32 1.0, %v2493_v19  ;;  %v1248_v17 = vmul.f32 %v1216_v3, %v3086_v54  ;;  %v3150_v31 = vpop.f32.mrb[25].mxu0  ;;  %v2074_v57 = vmul.f32 -1.442695, %v3147_v27 }
 0x1ab   : > { %v2497_v39 = vpop.eup %2496  ;;  %2514 = vrcp.f32 %v1125_v22  ;;  %v1127_v33 = vadd.f32 1.0, %v2495_v28  ;;  %v1305_v20 = vpack.c.bf16 %v1247_v15, %v1245_v13  ;;  %v3153_v44 = vpop.f32.mrb[26].mxu0  ;;  %v2075_v40 = vmul.f32 -1.442695, %v3150_v31 }
 0x1ac   : > { %v2499_v37 = vpop.eup %2498  ;;  %2516 = vrcp.f32 %v1126_v29  ;;  %v1128_v48 = vadd.f32 1.0, %v2497_v39  ;;  %v1306_v59 = vpack.c.bf16 %v1248_v17, %v1246_v5  ;;  %v3158_v41 = vpop.f32.mrb[27].mxu0  ;;  %v2076_v46 = vmul.f32 -1.442695, %v3153_v44 }
 0x1ad   : > { %v3160_v54 = vpop.f32.mrb[21].mxu1  ;;  %v2501_v42 = vpop.eup %2500  ;;  %v1217_v45 = vmul.f32 %v2499_v37, %v3064_v32  ;;  %2518 = vrcp.f32 %v1127_v33  ;;  %v2077_v52 = vmul.f32 -1.442695, %v3158_v41 }
 0x1ae   : > { %v3164_v61 = vpop.f32.mrb[22].mxu1  ;;  %v2503_v47 = vpop.eup %2502  ;;  %v1218_v50 = vmul.f32 %v2501_v42, %v3067_v35  ;;  %2520 = vrcp.f32 %v1128_v48  ;;  %1561 = vmatprep.mubr.bf16.mxu0 %v1306_v59 }
 0x1af   : > { %v3168_v0 = vpop.f32.mrb[23].mxu1  ;;  %v2505_v21 = vpop.eup %2504  ;;  %v1219_v56 = vmul.f32 %v2503_v47, %v3070_v38  ;;  %2522 = vpow2.f32 %v2074_v57  ;;  %v1249_v32 = vmul.f32 %v1217_v45, %v3100_v16  ;;  %1562 = vmatmul.mubr.bf16.gmra.mrb[40].mxu0 %v1305_v20 }
 0x1b0   : > { %v2507_v23 = vpop.eup %2506  ;;  %v1220_v25 = vmul.f32 %v2505_v21, %v3076_v43  ;;  %2524 = vpow2.f32 %v2075_v40  ;;  %v1250_v51 = vmul.f32 %v1218_v50, %v3106_v26  ;;  %v3183_v12 = vpop.f32.mrb[24].mxu1 }
 0x1b1   : > { %v2509_v35 = vpop.eup %2508  ;;  %v1129_v4 = vadd.f32 1.0, %v2507_v23  ;;  %2526 = vpow2.f32 %v2076_v46  ;;  %v1251_v6 = vmul.f32 %v1219_v56, %v3110_v30  ;;  %v3175_v53 = vpop.f32.mrb[28].mxu0 }
 0x1b2   : > { %v2511_v8 = vpop.eup %2510  ;;  %v1130_v9 = vadd.f32 1.0, %v2509_v35  ;;  %2528 = vpow2.f32 %v2077_v52  ;;  %v1252_v38 = vmul.f32 %v1220_v25, %v3114_v34  ;;  %v3178_v16 = vpop.f32.mrb[29].mxu0  ;;  %v2078_v26 = vmul.f32 -1.442695, %v3175_v53 }
 0x1b3   : > { %v2513_v1 = vpop.eup %2512  ;;  %2530 = vrcp.f32 %v1129_v4  ;;  %v1131_v43 = vadd.f32 1.0, %v2511_v8  ;;  %v1307_v11 = vpack.c.bf16 %v1251_v6, %v1249_v32  ;;  %v3181_v13 = vpop.f32.mrb[30].mxu0  ;;  %v2079_v5 = vmul.f32 -1.442695, %v3178_v16 }
 0x1b4   : > { %2532 = vrcp.f32 %v1130_v9  ;;  %v1132_v30 = vadd.f32 1.0, %v2513_v1  ;;  %v1308_v3 = vpack.c.bf16 %v1252_v38, %v1250_v51  ;;  %v3186_v19 = vpop.f32.mrb[31].mxu0  ;;  %v3188_v34 = vpop.f32.mrb[25].mxu1  ;;  %v2080_v15 = vmul.f32 -1.442695, %v3181_v13 }
 0x1b5   : > { %v2515_v22 = vpop.eup %2514  ;;  %2534 = vrcp.f32 %v1131_v43  ;;  %v3191_v28 = vpop.f32.mrb[26].mxu1  ;;  %v2081_v39 = vmul.f32 -1.442695, %v3186_v19 }
 0x1b6   : > { %v2517_v29 = vpop.eup %2516  ;;  %v1221_v17 = vmul.f32 %v2515_v22, %v3092_v7  ;;  %2536 = vrcp.f32 %v1132_v30  ;;  %1571 = vmatprep.mubr.bf16.mxu0 %v1308_v3  ;;  %v3195_v33 = vpop.f32.mrb[27].mxu1 }
 0x1b7   : > { %v2519_v20 = vpop.eup %2518  ;;  %v1222_v57 = vmul.f32 %v2517_v29, %v3095_v10  ;;  %2538 = vpow2.f32 %v2078_v26  ;;  %1572 = vmatmul.mubr.bf16.gmra.mrb[44].mxu0 %v1307_v11  ;;  %v3204_v21 = vpop.f32.mrb[28].mxu1 }
 0x1b8   : > { %v2521_v37 = vpop.eup %2520  ;;  %v1223_v48 = vmul.f32 %v2519_v20, %v3098_v14  ;;  %2540 = vpow2.f32 %v2079_v5  ;;  %v1253_v59 = vmul.f32 %v1221_v17, %v3128_v60  ;;  %v3206_v32 = vpop.f32.mrb[29].mxu1 }
 0x1b9   : > { %v2523_v40 = vpop.eup %2522  ;;  %v1224_v7 = vmul.f32 %v2521_v37, %v3104_v24  ;;  %2542 = vpow2.f32 %v2080_v15  ;;  %v1254_v42 = vmul.f32 %v1222_v57, %v3133_v2  ;;  %v1008_v25 = vpop.f32.mrb[30].mxu1 }
 0x1ba   : > { %v2525_v45 = vpop.eup %2524  ;;  %v1133_v46 = vadd.f32 1.0, %v2523_v40  ;;  %2544 = vpow2.f32 %v2081_v39  ;;  %v1255_v47 = vmul.f32 %v1223_v48, %v3137_v62  ;;  %v1010_v35 = vpop.f32.mrb[31].mxu1 }
 0x1bb   : > { %v2527_v10 = vpop.eup %2526  ;;  %v1134_v50 = vadd.f32 1.0, %v2525_v45  ;;  %v1256_v52 = vmul.f32 %v1224_v7, %v3140_v55 }
 0x1bc   : > { %v2529_v14 = vpop.eup %2528  ;;  %2546 = vrcp.f32 %v1133_v46  ;;  %v1135_v60 = vadd.f32 1.0, %v2527_v10  ;;  %v1309_v56 = vpack.c.bf16 %v1255_v47, %v1253_v59 }
 0x1bd   : > { %v2531_v24 = vpop.eup %2530  ;;  %2548 = vrcp.f32 %v1134_v50  ;;  %v1136_v2 = vadd.f32 1.0, %v2529_v14  ;;  %v1310_v23 = vpack.c.bf16 %v1256_v52, %v1254_v42  ;;  %v1270_v52 = vld [vmem:[#allocation2 + $0x8] sm:$0xff]  ;;  %v1271_v14 = vld [vmem:[#allocation2 + $0x10] sm:$0xff] }
 0x1be   : > { %v2533_v51 = vpop.eup %2532  ;;  %v1225_v62 = vmul.f32 %v2531_v24, %v3120_v18  ;;  %2550 = vrcp.f32 %v1135_v60 }
 0x1bf   : > { %v2535_v4 = vpop.eup %2534  ;;  %v1226_v55 = vmul.f32 %v2533_v51, %v3123_v49  ;;  %2552 = vrcp.f32 %v1136_v2  ;;  %1581 = vmatprep.mubr.bf16.mxu1 %v1310_v23  ;;  %v1273_v23 = vld [vmem:[#allocation2 + $0x20] sm:$0xff] }
 0x1c0   : > { %v2537_v6 = vpop.eup %2536  ;;  %v1227_v8 = vmul.f32 %v2535_v4, %v3126_v58  ;;  %v1257_v9 = vmul.f32 %v1225_v62, %v3155_v36  ;;  %1582 = vmatmul.mubr.bf16.vlgmr.msra.gmra.mrb[32].mxu1 %v1309_v56  ;;  %v1275_v62 = vld [vmem:[#allocation2 + $0x30] sm:$0xff] }
 0x1c1   : > { %v2539_v38 = vpop.eup %2538  ;;  %v1228_v1 = vmul.f32 %v2537_v6, %v3131_v63  ;;  %v1258_v43 = vmul.f32 %v1226_v55, %v3160_v54  ;;  %v1276_v55 = vld [vmem:[#allocation2 + $0x38] sm:$0xff] }
 0x1c2   : > { %v2541_v11 = vpop.eup %2540  ;;  %v1137_v18 = vadd.f32 1.0, %v2539_v38  ;;  %v1259_v26 = vmul.f32 %v1227_v8, %v3164_v61 }
 0x1c3   : > { %v2543_v30 = vpop.eup %2542  ;;  %v1138_v3 = vadd.f32 1.0, %v2541_v11  ;;  %v1260_v49 = vmul.f32 %v1228_v1, %v3168_v0  ;;  %v1278_v11 = vld [vmem:[#allocation2 + $0x48] sm:$0xff] }
 0x1c4   : > { %v2545_v5 = vpop.eup %2544  ;;  %2554 = vrcp.f32 %v1137_v18  ;;  %v1139_v22 = vadd.f32 1.0, %v2543_v30  ;;  %v1311_v58 = vpack.c.bf16 %v1259_v26, %v1257_v9  ;;  %v1279_v26 = vld [vmem:[#allocation2 + $0x50] sm:$0xff] }
 0x1c5   : > { %2556 = vrcp.f32 %v1138_v3  ;;  %v1140_v36 = vadd.f32 1.0, %v2545_v5  ;;  %v1312_v15 = vpack.c.bf16 %v1260_v49, %v1258_v43  ;;  %v1277_v43 = vld [vmem:[#allocation2 + $0x40] sm:$0xff]  ;;  %v1280_v49 = vld [vmem:[#allocation2 + $0x58] sm:$0xff] }
 0x1c6   : > { %v2547_v29 = vpop.eup %2546  ;;  %2558 = vrcp.f32 %v1139_v22 }
 0x1c7   : > { %v2549_v63 = vpop.eup %2548  ;;  %v1229_v54 = vmul.f32 %v2547_v29, %v3147_v27  ;;  %2560 = vrcp.f32 %v1140_v36  ;;  %1591 = vmatprep.mubr.bf16.mxu1 %v1312_v15  ;;  %v1281_v29 = vld [vmem:[#allocation2 + $0x60] sm:$0xff] }
 0x1c8   : > { %v2551_v17 = vpop.eup %2550  ;;  %v1230_v61 = vmul.f32 %v2549_v63, %v3150_v31  ;;  %1592 = vmatmul.mubr.bf16.gmra.mrb[36].mxu1 %v1311_v58  ;;  %v1282_v63 = vld [vmem:[#allocation2 + $0x68] sm:$0xff] }
 0x1c9   : > { %v2553_v39 = vpop.eup %2552  ;;  %v1231_v0 = vmul.f32 %v2551_v17, %v3153_v44  ;;  %v1261_v20 = vmul.f32 %v1229_v54, %v3183_v12  ;;  %v1283_v17 = vld [vmem:[#allocation2 + $0x70] sm:$0xff] }
 0x1ca   : > { %v1232_v57 = vmul.f32 %v2553_v39, %v3158_v41  ;;  %v1262_v37 = vmul.f32 %v1230_v61, %v3188_v34 }
 0x1cb   : > { %v1263_v48 = vmul.f32 %v1231_v0, %v3191_v28  ;;  %v1284_v0 = vld [vmem:[#allocation2 + $0x78] sm:$0xff] }
 0x1cc   : > { %v1264_v59 = vmul.f32 %v1232_v57, %v3195_v33 }
 0x1cd   : > { %v1313_v27 = vpack.c.bf16 %v1263_v48, %v1261_v20 }
 0x1ce   : > { %v2555_v40 = vpop.eup %2554  ;;  %v1314_v7 = vpack.c.bf16 %v1264_v59, %v1262_v37 }
 0x1cf   : > { %v2557_v42 = vpop.eup %2556  ;;  %v1233_v31 = vmul.f32 %v2555_v40, %v3175_v53  ;;  %v1269_v53 = vld [vmem:[#allocation2] sm:$0xff]  ;;  %v1286_v40 = vld [vmem:[#allocation2 + $0x88] sm:$0xff] }
 0x1d0   : > { %v2559_v45 = vpop.eup %2558  ;;  %v1234_v46 = vmul.f32 %v2557_v42, %v3178_v16  ;;  %1601 = vmatprep.mubr.bf16.mxu1 %v1314_v7  ;;  %v1287_v42 = vld [vmem:[#allocation2 + $0x90] sm:$0xff] }
 0x1d1   : > { %v2561_v44 = vpop.eup %2560  ;;  %v1235_v12 = vmul.f32 %v2559_v45, %v3181_v13  ;;  %v1265_v41 = vmul.f32 %v1233_v31, %v3204_v21  ;;  %1602 = vmatmul.mubr.bf16.gmra.mrb[40].mxu1 %v1313_v27  ;;  %v1272_v13 = vld [vmem:[#allocation2 + $0x18] sm:$0xff]  ;;  %v1285_v27 = vld [vmem:[#allocation2 + $0x80] sm:$0xff] }
 0x1d2   : > { %v1236_v34 = vmul.f32 %v2561_v44, %v3186_v19  ;;  %v1266_v28 = vmul.f32 %v1234_v46, %v3206_v32  ;;  %v1288_v46 = vld [vmem:[#allocation2 + $0x98] sm:$0xff] }
 0x1d3   : > { %v1267_v33 = vmul.f32 %v1235_v12, %v1008_v25  ;;  %v1274_v25 = vld [vmem:[#allocation2 + $0x28] sm:$0xff] }
 0x1d4   : > { %v1268_v47 = vmul.f32 %v1236_v34, %v1010_v35 }
 0x1d5   : > { %v1315_v10 = vpack.c.bf16 %v1267_v33, %v1265_v41  ;;  %v1289_v33 = vld [vmem:[#allocation2 + $0xa0] sm:$0xff] }
 0x1d6   : > { %v1316_v50 = vpack.c.bf16 %v1268_v47, %v1266_v28  ;;  %v1290_v47 = vld [vmem:[#allocation2 + $0xa8] sm:$0xff] }
 0x1d8   : > { %1611 = vmatprep.mubr.bf16.mxu1 %v1316_v50  ;;  %v1291_v50 = vld [vmem:[#allocation2 + $0xb0] sm:$0xff] }
 0x1d9   : > { %1612 = vmatmul.mubr.bf16.gmra.mrb[44].mxu1 %v1315_v10 }
 0x271   : > { %v1543_v16 = vpop.f32.mrb[32].mxu0 }
 0x272   : > { %v1622_v60 = vadd.f32 %v1543_v16, %v1269_v53  ;;  %v1545_v56 = vpop.f32.mrb[33].mxu0  ;;  %v1292_v16 = vld [vmem:[#allocation2 + $0xb8] sm:$0xff] }
 0x273   : > { %v1623_v24 = vadd.f32 %v1545_v56, %v1270_v52  ;;  %v1547_v21 = vpop.f32.mrb[34].mxu0 }
 0x274   : > { %1654 = vst [vmem:[#allocation2] sm:$0xff] %v1622_v60  ;;  %v1624_v2 = vadd.f32 %v1547_v21, %v1271_v14  ;;  %v1549_v19 = vpop.f32.mrb[35].mxu0  ;;  %v1293_v21 = vld [vmem:[#allocation2 + $0xc0] sm:$0xff] }
 0x275   : > { %1655 = vst [vmem:[#allocation2 + $0x8] sm:$0xff] %v1623_v24  ;;  %v1625_v32 = vadd.f32 %v1549_v19, %v1272_v13 }
 0x276   : > { %1656 = vst [vmem:[#allocation2 + $0x10] sm:$0xff] %v1624_v2  ;;  %v1294_v2 = vld [vmem:[#allocation2 + $0xc8] sm:$0xff] }
 0x277   : > { %1657 = vst [vmem:[#allocation2 + $0x18] sm:$0xff] %v1625_v32  ;;  %v1295_v32 = vld [vmem:[#allocation2 + $0xd0] sm:$0xff] }
 0x279   : > { %v1553_v51 = vpop.f32.mrb[36].mxu0 }
 0x27a   : > { %v1626_v35 = vadd.f32 %v1553_v51, %v1273_v23  ;;  %v1555_v4 = vpop.f32.mrb[37].mxu0  ;;  %v1296_v51 = vld [vmem:[#allocation2 + $0xd8] sm:$0xff] }
 0x27b   : > { %v1627_v6 = vadd.f32 %v1555_v4, %v1274_v25  ;;  %v1557_v8 = vpop.f32.mrb[38].mxu0 }
 0x27c   : > { %1658 = vst [vmem:[#allocation2 + $0x20] sm:$0xff] %v1626_v35  ;;  %v1628_v9 = vadd.f32 %v1557_v8, %v1275_v62  ;;  %v1559_v38 = vpop.f32.mrb[39].mxu0  ;;  %v1297_v8 = vld [vmem:[#allocation2 + $0xe0] sm:$0xff] }
 0x27d   : > { %1659 = vst [vmem:[#allocation2 + $0x28] sm:$0xff] %v1627_v6  ;;  %v1629_v1 = vadd.f32 %v1559_v38, %v1276_v55 }
 0x27e   : > { %1660 = vst [vmem:[#allocation2 + $0x30] sm:$0xff] %v1628_v9  ;;  %v1298_v9 = vld [vmem:[#allocation2 + $0xe8] sm:$0xff] }
 0x27f   : > { %1661 = vst [vmem:[#allocation2 + $0x38] sm:$0xff] %v1629_v1  ;;  %v1299_v1 = vld [vmem:[#allocation2 + $0xf0] sm:$0xff] }
 0x282   : > { %v1563_v18 = vpop.f32.mrb[40].mxu0 }
 0x283   : > { %v1630_v30 = vadd.f32 %v1563_v18, %v1277_v43  ;;  %v1565_v3 = vpop.f32.mrb[41].mxu0  ;;  %v1300_v18 = vld [vmem:[#allocation2 + $0xf8] sm:$0xff] }
 0x284   : > { %v1631_v5 = vadd.f32 %v1565_v3, %v1278_v11  ;;  %v1567_v22 = vpop.f32.mrb[42].mxu0 }
 0x285   : > { %1662 = vst [vmem:[#allocation2 + $0x40] sm:$0xff] %v1630_v30  ;;  %v1632_v58 = vadd.f32 %v1567_v22, %v1279_v26  ;;  %v1569_v36 = vpop.f32.mrb[43].mxu0  ;;  %v1690_v22 = vld [vmem:[#allocation2] sm:$0xff] (!%p2114_p5) }
 0x286   : > { %1663 = vst [vmem:[#allocation2 + $0x48] sm:$0xff] %v1631_v5  ;;  %v1633_v15 = vadd.f32 %v1569_v36, %v1280_v49  ;;  %v1692_v36 = vld [vmem:[#allocation2 + $0x10] sm:$0xff] (!%p2114_p5) }
 0x287   : > { %1664 = vst [vmem:[#allocation2 + $0x50] sm:$0xff] %v1632_v58  ;;  %v1691_v58 = vld [vmem:[#allocation2 + $0x8] sm:$0xff] (!%p2114_p5) }
 0x288   : > { %1665 = vst [vmem:[#allocation2 + $0x58] sm:$0xff] %v1633_v15  ;;  %v2137_v15 = vpack.c.bf16 (!%p2114_p5), %v1691_v58, %v1690_v22 }
 0x28a   : > { %v1573_v54 = vpop.f32.mrb[44].mxu0  ;;  %1818 = vst [vmem:[%s2897_s8] sm:$0xff] (!%p2114_p5), %v2137_v15 }
 0x28b   : > { %v1634_v61 = vadd.f32 %v1573_v54, %v1281_v29  ;;  %v1575_v39 = vpop.f32.mrb[45].mxu0  ;;  %v1693_v29 = vld [vmem:[#allocation2 + $0x18] sm:$0xff] (!%p2114_p5)  ;;  %v1695_v54 = vld [vmem:[#allocation2 + $0x28] sm:$0xff] (!%p2114_p5) }
 0x28c   : > { %v1635_v20 = vadd.f32 %v1575_v39, %v1282_v63  ;;  %v1577_v57 = vpop.f32.mrb[46].mxu0  ;;  %v1694_v63 = vld [vmem:[#allocation2 + $0x20] sm:$0xff] (!%p2114_p5)  ;;  %v1696_v39 = vld [vmem:[#allocation2 + $0x30] sm:$0xff] (!%p2114_p5) }
 0x28d   : > { %1666 = vst [vmem:[#allocation2 + $0x60] sm:$0xff] %v1634_v61  ;;  %v1636_v37 = vadd.f32 %v1577_v57, %v1283_v17  ;;  %v1579_v48 = vpop.f32.mrb[47].mxu0  ;;  %v2138_v17 = vpack.c.bf16 (!%p2114_p5), %v1693_v29, %v1692_v36  ;;  %v2139_v61 = vpack.c.bf16 (!%p2114_p5), %v1695_v54, %v1694_v63 }
 0x28e   : > { %1667 = vst [vmem:[#allocation2 + $0x68] sm:$0xff] %v1635_v20  ;;  %v1637_v59 = vadd.f32 %v1579_v48, %v1284_v0  ;;  %v1697_v0 = vld [vmem:[#allocation2 + $0x38] sm:$0xff] (!%p2114_p5)  ;;  %v1698_v20 = vld [vmem:[#allocation2 + $0x40] sm:$0xff] (!%p2114_p5)  ;;  %v1700_v48 = vld [vmem:[#allocation2 + $0x50] sm:$0xff] (!%p2114_p5) }
 0x28f   : > { %1668 = vst [vmem:[#allocation2 + $0x70] sm:$0xff] %v1636_v37  ;;  %v2140_v57 = vpack.c.bf16 (!%p2114_p5), %v1697_v0, %v1696_v39  ;;  %v1699_v37 = vld [vmem:[#allocation2 + $0x48] sm:$0xff] (!%p2114_p5)  ;;  %1819 = vst [vmem:[%s2897_s8 + $0x8] sm:$0xff] (!%p2114_p5), %v2138_v17 }
 0x290   : > { %1669 = vst [vmem:[#allocation2 + $0x78] sm:$0xff] %v1637_v59  ;;  %v1701_v59 = vld [vmem:[#allocation2 + $0x58] sm:$0xff] (!%p2114_p5)  ;;  %1820 = vst [vmem:[%s2897_s8 + $0x10] sm:$0xff] (!%p2114_p5), %v2139_v61 }
 0x291   : > { %1821 = vst [vmem:[%s2897_s8 + $0x18] sm:$0xff] (!%p2114_p5), %v2140_v57 }
 0x293   : > { %v1583_v7 = vpop.f32.mrb[32].mxu1 }
 0x294   : > { %v1638_v31 = vadd.f32 %v1583_v7, %v1285_v27  ;;  %v1585_v45 = vpop.f32.mrb[33].mxu1  ;;  %v2141_v27 = vpack.c.bf16 (!%p2114_p5), %v1699_v37, %v1698_v20  ;;  %v1702_v7 = vld [vmem:[#allocation2 + $0x60] sm:$0xff] (!%p2114_p5) }
 0x295   : > { %v1639_v44 = vadd.f32 %v1585_v45, %v1286_v40  ;;  %v1587_v12 = vpop.f32.mrb[34].mxu1  ;;  %v2142_v40 = vpack.c.bf16 (!%p2114_p5), %v1701_v59, %v1700_v48 }
 0x296   : > { %1670 = vst [vmem:[#allocation2 + $0x80] sm:$0xff] %v1638_v31  ;;  %v1640_v41 = vadd.f32 %v1587_v12, %v1287_v42  ;;  %v1589_v34 = vpop.f32.mrb[35].mxu1  ;;  %v1703_v42 = vld [vmem:[#allocation2 + $0x68] sm:$0xff] (!%p2114_p5)  ;;  %v1704_v31 = vld [vmem:[#allocation2 + $0x70] sm:$0xff] (!%p2114_p5)  ;;  %1822 = vst [vmem:[%s2897_s8 + $0x20] sm:$0xff] (!%p2114_p5), %v2141_v27 }
 0x297   : > { %1671 = vst [vmem:[#allocation2 + $0x88] sm:$0xff] %v1639_v44  ;;  %v1641_v28 = vadd.f32 %v1589_v34, %v1288_v46  ;;  %v2143_v45 = vpack.c.bf16 (!%p2114_p5), %v1703_v42, %v1702_v7  ;;  %v1705_v46 = vld [vmem:[#allocation2 + $0x78] sm:$0xff] (!%p2114_p5)  ;;  %1823 = vst [vmem:[%s2897_s8 + $0x28] sm:$0xff] (!%p2114_p5), %v2142_v40 }
 0x298   : > { %1672 = vst [vmem:[#allocation2 + $0x90] sm:$0xff] %v1640_v41  ;;  %v2144_v41 = vpack.c.bf16 (!%p2114_p5), %v1705_v46, %v1704_v31 }
 0x299   : > { %1673 = vst [vmem:[#allocation2 + $0x98] sm:$0xff] %v1641_v28  ;;  %1824 = vst [vmem:[%s2897_s8 + $0x30] sm:$0xff] (!%p2114_p5), %v2143_v45 }
 0x29a   : > { %1825 = vst [vmem:[%s2897_s8 + $0x38] sm:$0xff] (!%p2114_p5), %v2144_v41 }
 0x29b   : > { %v1593_v10 = vpop.f32.mrb[36].mxu1 }
 0x29c   : > { %v1642_v53 = vadd.f32 %v1593_v10, %v1289_v33  ;;  %v1595_v52 = vpop.f32.mrb[37].mxu1 }
 0x29d   : > { %v1643_v14 = vadd.f32 %v1595_v52, %v1290_v47  ;;  %v1597_v60 = vpop.f32.mrb[38].mxu1  ;;  %v1706_v44 = vld [vmem:[#allocation2 + $0x80] sm:$0xff] (!%p2114_p5) }
 0x29e   : > { %1674 = vst [vmem:[#allocation2 + $0xa0] sm:$0xff] %v1642_v53  ;;  %v1644_v56 = vadd.f32 %v1597_v60, %v1291_v50  ;;  %v1599_v13 = vpop.f32.mrb[39].mxu1  ;;  %v1707_v12 = vld [vmem:[#allocation2 + $0x88] sm:$0xff] (!%p2114_p5) }
 0x29f   : > { %1675 = vst [vmem:[#allocation2 + $0xa8] sm:$0xff] %v1643_v14  ;;  %v1645_v24 = vadd.f32 %v1599_v13, %v1292_v16  ;;  %v2145_v34 = vpack.c.bf16 (!%p2114_p5), %v1707_v12, %v1706_v44  ;;  %v1708_v28 = vld [vmem:[#allocation2 + $0x90] sm:$0xff] (!%p2114_p5) }
 0x2a0   : > { %1676 = vst [vmem:[#allocation2 + $0xb0] sm:$0xff] %v1644_v56  ;;  %v1709_v33 = vld [vmem:[#allocation2 + $0x98] sm:$0xff] (!%p2114_p5) }
 0x2a1   : > { %1677 = vst [vmem:[#allocation2 + $0xb8] sm:$0xff] %v1645_v24  ;;  %v2146_v10 = vpack.c.bf16 (!%p2114_p5), %v1709_v33, %v1708_v28  ;;  %1826 = vst [vmem:[%s2897_s8 + $0x40] sm:$0xff] (!%p2114_p5), %v2145_v34 }
 0x2a3   : > { %1827 = vst [vmem:[%s2897_s8 + $0x48] sm:$0xff] (!%p2114_p5), %v2146_v10 }
 0x2a4   : > { %v1603_v19 = vpop.f32.mrb[40].mxu1 }
 0x2a5   : > { %v1646_v23 = vadd.f32 %v1603_v19, %v1293_v21  ;;  %v1605_v25 = vpop.f32.mrb[41].mxu1  ;;  %v1710_v47 = vld [vmem:[#allocation2 + $0xa0] sm:$0xff] (!%p2114_p5) }
 0x2a6   : > { %v1647_v62 = vadd.f32 %v1605_v25, %v1294_v2  ;;  %v1607_v35 = vpop.f32.mrb[42].mxu1  ;;  %v1711_v50 = vld [vmem:[#allocation2 + $0xa8] sm:$0xff] (!%p2114_p5) }
 0x2a7   : > { %1678 = vst [vmem:[#allocation2 + $0xc0] sm:$0xff] %v1646_v23  ;;  %v1648_v4 = vadd.f32 %v1607_v35, %v1295_v32  ;;  %v1609_v55 = vpop.f32.mrb[43].mxu1  ;;  %v1712_v53 = vld [vmem:[#allocation2 + $0xb0] sm:$0xff] (!%p2114_p5)  ;;  %v2147_v16 = vpack.c.bf16 (!%p2114_p5), %v1711_v50, %v1710_v47 }
 0x2a8   : > { %1679 = vst [vmem:[#allocation2 + $0xc8] sm:$0xff] %v1647_v62  ;;  %v1649_v6 = vadd.f32 %v1609_v55, %v1296_v51  ;;  %v1713_v52 = vld [vmem:[#allocation2 + $0xb8] sm:$0xff] (!%p2114_p5) }
 0x2a9   : > { %1680 = vst [vmem:[#allocation2 + $0xd0] sm:$0xff] %v1648_v4  ;;  %v2148_v14 = vpack.c.bf16 (!%p2114_p5), %v1713_v52, %v1712_v53  ;;  %1828 = vst [vmem:[%s2897_s8 + $0x50] sm:$0xff] (!%p2114_p5), %v2147_v16 }
 0x2aa   : > { %1681 = vst [vmem:[#allocation2 + $0xd8] sm:$0xff] %v1649_v6 }
 0x2ab   : > { %1829 = vst [vmem:[%s2897_s8 + $0x58] sm:$0xff] (!%p2114_p5), %v2148_v14 }
 0x2ac   : > { %v1613_v38 = vpop.f32.mrb[44].mxu1  ;;  %1689 = sbr.rel (%p2114_p5) target bundleno = 701 (0x2bd), region = 48 }
 0x2ad   : > { %v1650_v43 = vadd.f32 %v1613_v38, %v1297_v8  ;;  %v1615_v11 = vpop.f32.mrb[45].mxu1 }
 0x2ae   : > { %v1651_v26 = vadd.f32 %v1615_v11, %v1298_v9  ;;  %v1617_v30 = vpop.f32.mrb[46].mxu1  ;;  %v1714_v60 = vld [vmem:[#allocation2 + $0xc0] sm:$0xff] (!%p2114_p5) }
 0x2af   : > { %1682 = vst [vmem:[#allocation2 + $0xe0] sm:$0xff] %v1650_v43  ;;  %v1652_v3 = vadd.f32 %v1617_v30, %v1299_v1  ;;  %v1619_v49 = vpop.f32.mrb[47].mxu1  ;;  %v1715_v56 = vld [vmem:[#allocation2 + $0xc8] sm:$0xff] (!%p2114_p5) }
 0x2b0   : > { %1683 = vst [vmem:[#allocation2 + $0xe8] sm:$0xff] %v1651_v26  ;;  %v1653_v5 = vadd.f32 %v1619_v49, %v1300_v18  ;;  %v1716_v13 = vld [vmem:[#allocation2 + $0xd0] sm:$0xff] (!%p2114_p5)  ;;  %v2149_v24 = vpack.c.bf16 (!%p2114_p5), %v1715_v56, %v1714_v60 }
 0x2b1   : > { %1684 = vst [vmem:[#allocation2 + $0xf0] sm:$0xff] %v1652_v3  ;;  %v1717_v21 = vld [vmem:[#allocation2 + $0xd8] sm:$0xff] (!%p2114_p5) }
 0x2b2   : > { %1685 = vst [vmem:[#allocation2 + $0xf8] sm:$0xff] %v1653_v5  ;;  %v2150_v32 = vpack.c.bf16 (!%p2114_p5), %v1717_v21, %v1716_v13  ;;  %1830 = vst [vmem:[%s2897_s8 + $0x60] sm:$0xff] (!%p2114_p5), %v2149_v24 }
 0x2b4   : > { %1831 = vst [vmem:[%s2897_s8 + $0x68] sm:$0xff] %v2150_v32 }
 0x2b6   : > { %v1718_v2 = vld [vmem:[#allocation2 + $0xe0] sm:$0xff] }
 0x2b7   : > { %v1719_v19 = vld [vmem:[#allocation2 + $0xe8] sm:$0xff] }
 0x2b8   : > { %v2151_v23 = vpack.c.bf16 %v1719_v19, %v1718_v2  ;;  %v1720_v25 = vld [vmem:[#allocation2 + $0xf0] sm:$0xff] }
 0x2b9   : > { %v1721_v51 = vld [vmem:[#allocation2 + $0xf8] sm:$0xff] }
 0x2ba   : > { %v2152_v62 = vpack.c.bf16 %v1721_v51, %v1720_v25  ;;  %1832 = vst [vmem:[%s2897_s8 + $0x70] sm:$0xff] %v2151_v23 }
 0x2bc   : > { %1833 = vst [vmem:[%s2897_s8 + $0x78] sm:$0xff] %v2152_v62 }
 0x2bd PF: > { %s19_s19 = sadd.s32 1, %s2692_s19   ;;  %s3281_s12 = smov %s2668_s13 }
 0x2be   : > { %p16_p8 = scmp.ge.s32.totalorder %s19_s19, 6   ;;  %s3282_s13 = smov %s2672_s14 }
 0x2bf   : > { %s3283_s14 = smov %s2779_s26  ;;  %s3284_s15 = smov %s2684_s17 }
 0x2c0   : > { %s3285_s16 = smov %s2688_s18  ;;  %s3286_s17 = smov %s3289_s21 }
 0x2c1   : > { %s3287_s18 = smov %s3293_s22  ;;  %18 = sbr.rel (!%p16_p8) target bundleno = 7 (0x7), region = 96 }
 0x2c8   :  { %1858 = vsyncpa [#allocation4], 1 }
 0x2c9   :  { %1860 = vsyncpa [#allocation4 + $0x1], 1 }
 0x2ca   :  { %1861 = vsyncpa [#allocation6], 1 }
 0x2cb   :  { %1863 = vsyncpa [#allocation6 + $0x1], 1 }

</bundles_post_ra>
